<compile_context>
chip_gen: v7x
topology: tpu7x:2x2x1
jax: 0.10.0
libtpu: 0.0.40
codegen_flags: <defaults>
</compile_context>

<pallas_src>
import functools

import jax
import jax.numpy as jnp
from jax.experimental import pallas as pl
from jax.experimental.pallas import tpu as pltpu


def _round_up(x, m):
    return (x + m - 1) // m * m


def _router_kernel(coarse_ref, fine_ref, w1c_ref, w1f_ref, b1_ref, w2_ref, b2_ref,
                   out_ref):
    # coarse_ref: (tm, C) bf16 ; fine_ref: (4, tm, C) bf16 (pool-position-major).
    # AvgPool2d(2,2): three full-vreg adds over the leading pool axis, f32 accumulate.
    avg_fine = (fine_ref[0].astype(jnp.float32) + fine_ref[1].astype(jnp.float32)
                + fine_ref[2].astype(jnp.float32) + fine_ref[3].astype(jnp.float32)
                ) * 0.25

    # Linear(2C -> 2C) as a split matmul (== cat([coarse, avg_fine], lane) @ W1).
    h = jnp.dot(coarse_ref[...], w1c_ref[...], preferred_element_type=jnp.float32)
    h = h + jnp.dot(avg_fine.astype(jnp.bfloat16), w1f_ref[...],
                    preferred_element_type=jnp.float32)
    h = h + b1_ref[...]

    # SiLU (VPU mul + EUP sigmoid).
    h = h * jax.nn.sigmoid(h)

    # Linear(2C -> 2).
    g = jnp.dot(h.astype(jnp.bfloat16), w2_ref[...],
                preferred_element_type=jnp.float32) + b2_ref[...]
    out_ref[...] = g.astype(out_ref.dtype)


def dual_grain_feature_router(h_coarse, h_fine, params, *, tm=1024):
    """h_coarse: (N, C, H, W); h_fine: (N, C, 2H, 2W). Returns gate (N, H, W, 2)."""
    N, C, H, W = h_coarse.shape
    assert h_fine.shape == (N, C, 2 * H, 2 * W)
    M = N * H * W

    # ---- tile-size selection (perf-driven, not divisibility-driven) ----------------
    # Big row tiles amortize the ~0.35us/grid-step overhead (mem-bound kernel). Keep
    # at least 2 grid steps so the "parallel" grid axis can shard across v7x's two
    # TensorCores, and cap the tile by a rough per-row VMEM footprint (~48*C bytes:
    # double-buffered bf16 inputs + f32 temporaries) to stay inside v7x's 64 MiB VMEM.
    tm = max(128, min(tm, _round_up(pl.cdiv(M, 2), 128)))
    tm_cap = max(128, ((16 * 1024 * 1024) // (48 * C)) // 128 * 128)
    tm = min(tm, tm_cap)
    Mp = _round_up(M, tm)

    # ---- layout plumbing only (all forward compute stays in the kernel) ------------
    coarse_rows = (jnp.transpose(h_coarse, (0, 2, 3, 1))
                   .reshape(M, C).astype(jnp.bfloat16))
    # fine_p4[a*2+b, n*H*W + i*W + j, c] == h_fine[n, c, 2*i+a, 2*j+b]
    fine_p4 = (h_fine.reshape(N, C, H, 2, W, 2)
               .transpose(3, 5, 0, 2, 4, 1)          # (2, 2, N, H, W, C)
               .reshape(4, M, C).astype(jnp.bfloat16))
    if Mp != M:
        coarse_rows = jnp.pad(coarse_rows, ((0, Mp - M), (0, 0)))
        fine_p4 = jnp.pad(fine_p4, ((0, 0), (0, Mp - M), (0, 0)))

    w1, b1, w2, b2 = params              # w1:(2C,2C) [in,out], b1:(1,2C), w2:(2C,2), b2:(1,2)
    w1c = w1[:C].astype(jnp.bfloat16)    # coarse half of Linear1
    w1f = w1[C:].astype(jnp.bfloat16)    # fine half of Linear1
    w2b = w2.astype(jnp.bfloat16)
    b1 = b1.astype(jnp.float32)
    b2 = b2.astype(jnp.float32)

    # Explicit VMEM budget: double-buffered bf16 activation tiles per step, 4x slack.
    act_bytes_per_step = 2 * 2 * 5 * tm * C
    vmem_limit_bytes = min(64 * 1024 * 1024,
                           max(32 * 1024 * 1024, 4 * act_bytes_per_step))

    grid = (Mp // tm,)
    out = pl.pallas_call(
        _router_kernel,
        out_shape=jax.ShapeDtypeStruct((Mp, 2), jnp.float32),
        grid=grid,
        in_specs=[
            pl.BlockSpec((tm, C), lambda i: (i, 0)),         # coarse rows
            pl.BlockSpec((4, tm, C), lambda i: (0, i, 0)),   # fine rows, pool-major
            pl.BlockSpec((C, 2 * C), lambda i: (0, 0)),      # W1 coarse half (resident)
            pl.BlockSpec((C, 2 * C), lambda i: (0, 0)),      # W1 fine half (resident)
            pl.BlockSpec((1, 2 * C), lambda i: (0, 0)),      # b1
            pl.BlockSpec((2 * C, 2), lambda i: (0, 0)),      # W2
            pl.BlockSpec((1, 2), lambda i: (0, 0)),          # b2
        ],
        out_specs=pl.BlockSpec((tm, 2), lambda i: (i, 0)),
        compiler_params=pltpu.CompilerParams(
            dimension_semantics=("parallel",),
            vmem_limit_bytes=vmem_limit_bytes,
        ),
    )(coarse_rows, fine_p4, w1c, w1f, b1, w2b, b2)

    return out[:M].reshape(N, H, W, 2).astype(h_coarse.dtype)


def init_params(key, num_channels):
    """Deterministic synthetic init of the gate MLP (PyTorch Linear shapes, stored as [in,out])."""
    C2 = 2 * num_channels
    k1, k2, k3, k4 = jax.random.split(key, 4)
    w1 = jax.random.normal(k1, (C2, C2), jnp.float32) * (1.0 / jnp.sqrt(C2))
    b1 = jax.random.normal(k2, (1, C2), jnp.float32) * 0.01
    w2 = jax.random.normal(k3, (C2, 2), jnp.float32) * (1.0 / jnp.sqrt(C2))
    b2 = jax.random.normal(k4, (1, 2), jnp.float32) * 0.01
    return w1, b1, w2, b2


def _reference(h_coarse, h_fine, params):
    """Pure-JAX f32 reference replicating the PyTorch forward (num_groups=None)."""
    w1, b1, w2, b2 = params
    N, C, H, W = h_coarse.shape
    avg_fine = h_fine.reshape(N, C, H, 2, W, 2).mean(axis=(3, 5))       # AvgPool2d(2,2)
    x = jnp.concatenate([h_coarse, avg_fine], axis=1)                    # (N, 2C, H, W)
    x = jnp.transpose(x, (0, 2, 3, 1))                                   # (N, H, W, 2C)
    h = x @ w1 + b1[0]
    h = h * jax.nn.sigmoid(h)
    return h @ w2 + b2[0]                                                # (N, H, W, 2)


if __name__ == "__main__":
    key = jax.random.PRNGKey(0)
    k_c, k_f, k_p = jax.random.split(key, 3)

    N, C, H, W = 2, 4, 16, 16
    h_coarse = jax.random.normal(k_c, (N, C, H, W), jnp.float32)
    h_fine = jax.random.normal(k_f, (N, C, 2 * H, 2 * W), jnp.float32)
    params = init_params(k_p, C)

    router = jax.jit(functools.partial(dual_grain_feature_router, tm=1024))
    gate = jax.block_until_ready(router(h_coarse, h_fine, params))

    ref = _reference(h_coarse, h_fine, params)
    assert gate.shape == (N, H, W, 2)
    # bf16 activations/weights on the MXU (f32 accumulation) -> loosened tolerance
    # vs. the pure-f32 reference.
    assert jnp.allclose(gate, ref, atol=5e-2, rtol=5e-2), float(
        jnp.max(jnp.abs(gate - ref)))

    print("KERNEL_OK")
</pallas_src>

<mosaic_0001>
module attributes {stable_mosaic.version = 11 : i64} {
  func.func @_router_kernel(%arg0: i32, %arg1: memref<256x4xbf16, #tpu.memory_space<vmem>>, %arg2: memref<4x256x4xbf16, #tpu.memory_space<vmem>>, %arg3: memref<4x8xbf16, #tpu.memory_space<vmem>>, %arg4: memref<4x8xbf16, #tpu.memory_space<vmem>>, %arg5: memref<1x8xf32, #tpu.memory_space<vmem>>, %arg6: memref<8x2xbf16, #tpu.memory_space<vmem>>, %arg7: memref<1x2xf32, #tpu.memory_space<vmem>>, %arg8: memref<256x2xf32, #tpu.memory_space<vmem>>) attributes {dimension_semantics = [#tpu.dimension_semantics<parallel>], iteration_bounds = array<i64: 2>, scalar_prefetch = 0 : i64, scratch_operands = 0 : i64, tpu.core_type = #tpu.core_type<tc>, window_params = [{transform_indices = @transform_0, window_bounds = array<i64: 256, 4>}, {transform_indices = @transform_1, window_bounds = array<i64: 4, 256, 4>}, {pipeline_mode = #tpu.pipeline_mode<synchronous>, transform_indices = @transform_2, window_bounds = array<i64: 4, 8>}, {pipeline_mode = #tpu.pipeline_mode<synchronous>, transform_indices = @transform_3, window_bounds = array<i64: 4, 8>}, {pipeline_mode = #tpu.pipeline_mode<synchronous>, transform_indices = @transform_4, window_bounds = array<i64: 1, 8>}, {pipeline_mode = #tpu.pipeline_mode<synchronous>, transform_indices = @transform_5, window_bounds = array<i64: 8, 2>}, {pipeline_mode = #tpu.pipeline_mode<synchronous>, transform_indices = @transform_6, window_bounds = array<i64: 1, 2>}, {transform_indices = @transform_7, window_bounds = array<i64: 256, 2>}]} {
    %c0 = arith.constant 0 : index
    %c0_0 = arith.constant 0 : index
    %c0_1 = arith.constant 0 : index
    %0 = vector.load %arg2[%c0, %c0_0, %c0_1] : memref<4x256x4xbf16, #tpu.memory_space<vmem>>, vector<1x256x4xbf16>
    %1 = vector.shape_cast %0 : vector<1x256x4xbf16> to vector<256x4xbf16>
    %2 = arith.extf %1 : vector<256x4xbf16> to vector<256x4xf32>
    %c1 = arith.constant 1 : index
    %c0_2 = arith.constant 0 : index
    %c0_3 = arith.constant 0 : index
    %3 = vector.load %arg2[%c1, %c0_2, %c0_3] : memref<4x256x4xbf16, #tpu.memory_space<vmem>>, vector<1x256x4xbf16>
    %4 = vector.shape_cast %3 : vector<1x256x4xbf16> to vector<256x4xbf16>
    %5 = arith.extf %4 : vector<256x4xbf16> to vector<256x4xf32>
    %6 = arith.addf %2, %5 : vector<256x4xf32>
    %c2 = arith.constant 2 : index
    %c0_4 = arith.constant 0 : index
    %c0_5 = arith.constant 0 : index
    %7 = vector.load %arg2[%c2, %c0_4, %c0_5] : memref<4x256x4xbf16, #tpu.memory_space<vmem>>, vector<1x256x4xbf16>
    %8 = vector.shape_cast %7 : vector<1x256x4xbf16> to vector<256x4xbf16>
    %9 = arith.extf %8 : vector<256x4xbf16> to vector<256x4xf32>
    %10 = arith.addf %6, %9 : vector<256x4xf32>
    %c3 = arith.constant 3 : index
    %c0_6 = arith.constant 0 : index
    %c0_7 = arith.constant 0 : index
    %11 = vector.load %arg2[%c3, %c0_6, %c0_7] : memref<4x256x4xbf16, #tpu.memory_space<vmem>>, vector<1x256x4xbf16>
    %12 = vector.shape_cast %11 : vector<1x256x4xbf16> to vector<256x4xbf16>
    %13 = arith.extf %12 : vector<256x4xbf16> to vector<256x4xf32>
    %14 = arith.addf %10, %13 : vector<256x4xf32>
    %cst = arith.constant 2.500000e-01 : f32
    %15 = vector.broadcast %cst : f32 to vector<256x4xf32>
    %16 = arith.mulf %14, %15 : vector<256x4xf32>
    %c0_8 = arith.constant 0 : index
    %c0_9 = arith.constant 0 : index
    %17 = vector.load %arg1[%c0_8, %c0_9] : memref<256x4xbf16, #tpu.memory_space<vmem>>, vector<256x4xbf16>
    %c0_10 = arith.constant 0 : index
    %c0_11 = arith.constant 0 : index
    %18 = vector.load %arg3[%c0_10, %c0_11] : memref<4x8xbf16, #tpu.memory_space<vmem>>, vector<4x8xbf16>
    %cst_12 = arith.constant dense<0.000000e+00> : vector<256x8xf32>
    %19 = tpu.matmul %17, %18, %cst_12 {dimension_numbers = #tpu.dot_dimension_numbers<[1], [0], [0], [1], [0, 0, 1, 1], [], []>} : vector<256x4xbf16>, vector<4x8xbf16>, vector<256x8xf32> -> vector<256x8xf32>
    %20 = arith.truncf %16 : vector<256x4xf32> to vector<256x4xbf16>
    %c0_13 = arith.constant 0 : index
    %c0_14 = arith.constant 0 : index
    %21 = vector.load %arg4[%c0_13, %c0_14] : memref<4x8xbf16, #tpu.memory_space<vmem>>, vector<4x8xbf16>
    %cst_15 = arith.constant dense<0.000000e+00> : vector<256x8xf32>
    %22 = tpu.matmul %20, %21, %cst_15 {dimension_numbers = #tpu.dot_dimension_numbers<[1], [0], [0], [1], [0, 0, 1, 1], [], []>} : vector<256x4xbf16>, vector<4x8xbf16>, vector<256x8xf32> -> vector<256x8xf32>
    %23 = arith.addf %19, %22 : vector<256x8xf32>
    %c0_16 = arith.constant 0 : index
    %c0_17 = arith.constant 0 : index
    %24 = vector.load %arg5[%c0_16, %c0_17] : memref<1x8xf32, #tpu.memory_space<vmem>>, vector<1x8xf32>
    %25 = vector.broadcast %24 : vector<1x8xf32> to vector<256x8xf32>
    %26 = arith.addf %23, %25 : vector<256x8xf32>
    %27 = arith.negf %26 : vector<256x8xf32>
    %28 = math.exp %27 : vector<256x8xf32>
    %cst_18 = arith.constant 1.000000e+00 : f32
    %29 = vector.broadcast %cst_18 : f32 to vector<256x8xf32>
    %30 = arith.addf %29, %28 : vector<256x8xf32>
    %31 = arith.divf %29, %30 : vector<256x8xf32>
    %32 = arith.mulf %26, %31 : vector<256x8xf32>
    %33 = arith.truncf %32 : vector<256x8xf32> to vector<256x8xbf16>
    %c0_19 = arith.constant 0 : index
    %c0_20 = arith.constant 0 : index
    %34 = vector.load %arg6[%c0_19, %c0_20] : memref<8x2xbf16, #tpu.memory_space<vmem>>, vector<8x2xbf16>
    %cst_21 = arith.constant dense<0.000000e+00> : vector<256x2xf32>
    %35 = tpu.matmul %33, %34, %cst_21 {dimension_numbers = #tpu.dot_dimension_numbers<[1], [0], [0], [1], [0, 0, 1, 1], [], []>} : vector<256x8xbf16>, vector<8x2xbf16>, vector<256x2xf32> -> vector<256x2xf32>
    %c0_22 = arith.constant 0 : index
    %c0_23 = arith.constant 0 : index
    %36 = vector.load %arg7[%c0_22, %c0_23] : memref<1x2xf32, #tpu.memory_space<vmem>>, vector<1x2xf32>
    %37 = vector.broadcast %36 : vector<1x2xf32> to vector<256x2xf32>
    %38 = arith.addf %35, %37 : vector<256x2xf32>
    %c0_24 = arith.constant 0 : index
    %c0_25 = arith.constant 0 : index
    %39 = vector.load %arg8[%c0_24, %c0_25] : memref<256x2xf32, #tpu.memory_space<vmem>>, vector<256x2xf32>
    tpu.vector_store %arg8[%c0_24, %c0_25], %38 {strides = array<i32>} : memref<256x2xf32, #tpu.memory_space<vmem>>, vector<256x2xf32>,
    return
  }
  func.func @transform_0(%arg0: i32) -> (i32, i32) {
    %c0_i32 = arith.constant 0 : i32
    %c0_i32_0 = arith.constant 0 : i32
    return %arg0, %c0_i32 : i32, i32
  }
  func.func @transform_1(%arg0: i32) -> (i32, i32, i32) {
    %c0_i32 = arith.constant 0 : i32
    %c0_i32_0 = arith.constant 0 : i32
    %c0_i32_1 = arith.constant 0 : i32
    return %c0_i32, %arg0, %c0_i32_0 : i32, i32, i32
  }
  func.func @transform_2(%arg0: i32) -> (i32, i32) {
    %c0_i32 = arith.constant 0 : i32
    %c0_i32_0 = arith.constant 0 : i32
    %c0_i32_1 = arith.constant 0 : i32
    return %c0_i32, %c0_i32_0 : i32, i32
  }
  func.func @transform_3(%arg0: i32) -> (i32, i32) {
    %c0_i32 = arith.constant 0 : i32
    %c0_i32_0 = arith.constant 0 : i32
    %c0_i32_1 = arith.constant 0 : i32
    return %c0_i32, %c0_i32_0 : i32, i32
  }
  func.func @transform_4(%arg0: i32) -> (i32, i32) {
    %c0_i32 = arith.constant 0 : i32
    %c0_i32_0 = arith.constant 0 : i32
    %c0_i32_1 = arith.constant 0 : i32
    return %c0_i32, %c0_i32_0 : i32, i32
  }
  func.func @transform_5(%arg0: i32) -> (i32, i32) {
    %c0_i32 = arith.constant 0 : i32
    %c0_i32_0 = arith.constant 0 : i32
    %c0_i32_1 = arith.constant 0 : i32
    return %c0_i32, %c0_i32_0 : i32, i32
  }
  func.func @transform_6(%arg0: i32) -> (i32, i32) {
    %c0_i32 = arith.constant 0 : i32
    %c0_i32_0 = arith.constant 0 : i32
    %c0_i32_1 = arith.constant 0 : i32
    return %c0_i32, %c0_i32_0 : i32, i32
  }
  func.func @transform_7(%arg0: i32) -> (i32, i32) {
    %c0_i32 = arith.constant 0 : i32
    %c0_i32_0 = arith.constant 0 : i32
    return %arg0, %c0_i32 : i32, i32
  }
}

</mosaic_0001>

<bundles_post_ra>
// kernel: dual_grain_feature_router.1
= control target key start
LH: loop header
LB: loop body
LE: loop exit
PB: predicated region body
PF: predicated region fallthrough
CT: control target
= control target key end

     0   :  { %s3357_s24 = smov 0   ;;  %s3359_s25 = smov 0   ;;  %s4014_s0 = inlined_call_operand.vmem [shape: bf16[512,4], index: 0, kind: input, shape index: {}]   ;;  %s4015_s1 = inlined_call_operand.vmem [shape: bf16[4,512,4], index: 1, kind: input, shape index: {}]   ;;  %s4016_s2 = inlined_call_operand.vmem [shape: bf16[4,8], index: 2, kind: input, shape index: {}]   ;;  %s4017_s3 = inlined_call_operand.vmem [shape: bf16[4,8], index: 3, kind: input, shape index: {}]   ;;  %s4018_s4 = inlined_call_operand.vmem [shape: f32[1,8], index: 4, kind: input, shape index: {}]   ;;  %s4019_s5 = inlined_call_operand.vmem [shape: bf16[8,2], index: 5, kind: input, shape index: {}]   ;;  %s4020_s6 = inlined_call_operand.vmem [shape: f32[1,2], index: 6, kind: input, shape index: {}]   ;;  %s4021_s7 = inlined_call_operand.vmem [shape: f32[512,2], index: 7, kind: output, shape index: {}]  }
   0x1   :  { %s3361_s26 = smov 0  }
   0x2 LB: > { %s2405_s27 = sadd.s32 4294967295, %s3315_s26   ;;  %s3374_s28 = sadd.s32 1, %s3315_s26   ;;  %s3315_s26 = sphi %s3361_s26, %s4024_s26   ;;  %s3311_s25 = sphi %s3359_s25, %s4023_s25   ;;  %s3307_s24 = sphi %s3357_s24, %s4022_s24  }
   0x3   : > { %s47_s29 = ssub.s32 %s3315_s26, %s3374_s28  ;;  %s50_s30 = sadd.s32 1, %s3311_s25 }
   0x4   : > { %p48_p0 = scmp.eq.s32.totalorder %s47_s29, 0  ;;  %p57_p1 = scmp.ne.s32.totalorder %s3311_s25, %s3307_s24 }
   0x5   : > { %p58_p2 = scmp.eq.s32.totalorder %s3315_s26, 0  ;;  %p2408_p4 = scmp.ge.s32.totalorder %s3315_s26, 2 }
   0x6   : > { %s3383_s8 = scalar_select %p48_p0, %s3311_s25, %s50_s30  }
   0x7   : > { %p59_p3 = por %p58_p2, %p57_p1  ;;  %229 = sbr.rel (%p2408_p4) target bundleno = 50 (0x32), region = 36 }
   0xe   : > { %241 = sbr.rel (!%p59_p3) target bundleno = 50 (0x32), region = 44  ;;  %s243_s9 = sand.u32 (%p59_p3), 1, %s3311_s25  }
   0xf   : > { %s2614_s10 = sshll.u32 (%p59_p3), %s3315_s26, 7  ;;  %s2409_s11 = sshll.u32 (%p59_p3), %s243_s9, 9 }
  0x10   : > { %s3391_s14 = scalar_lea.vmem (%p59_p3), %s4015_s1, %s2614_s10  ;;  %s3396_s15 = scalar_lea.vmem (%p59_p3), [#allocation2], %s2409_s11 }
  0x11   : > { %v264_v0 = vld [vmem:[%s3391_s14] sm:$0xff] (%p59_p3)   ;;  %v268_v1 = vld [vmem:[%s3391_s14 + $0x8] sm:$0xff] (%p59_p3)   ;;  %v272_v2 = vld [vmem:[%s3391_s14 + $0x10] sm:$0xff] (%p59_p3)  }
  0x12   : > { %265 = vst [vmem:[%s3396_s15] sm:$0xff] (%p59_p3), %v264_v0   ;;  %269 = vst [vmem:[%s3396_s15 + $0x8] sm:$0xff] (%p59_p3), %v268_v1   ;;  %v276_v3 = vld [vmem:[%s3391_s14 + $0x18] sm:$0xff] (%p59_p3)   ;;  %v280_v4 = vld [vmem:[%s3391_s14 + $0x20] sm:$0xff] (%p59_p3)  }
  0x13   : > { %273 = vst [vmem:[%s3396_s15 + $0x10] sm:$0xff] (%p59_p3), %v272_v2   ;;  %v284_v5 = vld [vmem:[%s3391_s14 + $0x28] sm:$0xff] (%p59_p3)   ;;  %277 = vst [vmem:[%s3396_s15 + $0x18] sm:$0xff] (%p59_p3), %v276_v3   ;;  %v288_v6 = vld [vmem:[%s3391_s14 + $0x30] sm:$0xff] (%p59_p3)  }
  0x14   : > { %281 = vst [vmem:[%s3396_s15 + $0x20] sm:$0xff] (%p59_p3), %v280_v4   ;;  %285 = vst [vmem:[%s3396_s15 + $0x28] sm:$0xff] (%p59_p3), %v284_v5   ;;  %v292_v7 = vld [vmem:[%s3391_s14 + $0x38] sm:$0xff] (%p59_p3)   ;;  %v296_v8 = vld [vmem:[%s3391_s14 + $0x40] sm:$0xff] (%p59_p3)  }
  0x15   : > { %289 = vst [vmem:[%s3396_s15 + $0x30] sm:$0xff] %v288_v6   ;;  %293 = vst [vmem:[%s3396_s15 + $0x38] sm:$0xff] %v292_v7   ;;  %v300_v9 = vld [vmem:[%s3391_s14 + $0x48] sm:$0xff]   ;;  %v304_v10 = vld [vmem:[%s3391_s14 + $0x50] sm:$0xff]  }
  0x16   : > { %297 = vst [vmem:[%s3396_s15 + $0x40] sm:$0xff] %v296_v8   ;;  %v308_v11 = vld [vmem:[%s3391_s14 + $0x58] sm:$0xff]   ;;  %301 = vst [vmem:[%s3396_s15 + $0x48] sm:$0xff] %v300_v9   ;;  %v312_v12 = vld [vmem:[%s3391_s14 + $0x60] sm:$0xff]  }
  0x17   : > { %305 = vst [vmem:[%s3396_s15 + $0x50] sm:$0xff] %v304_v10   ;;  %309 = vst [vmem:[%s3396_s15 + $0x58] sm:$0xff] %v308_v11   ;;  %v316_v13 = vld [vmem:[%s3391_s14 + $0x68] sm:$0xff]   ;;  %v320_v14 = vld [vmem:[%s3391_s14 + $0x70] sm:$0xff]  }
  0x18   : > { %313 = vst [vmem:[%s3396_s15 + $0x60] sm:$0xff] %v312_v12   ;;  %317 = vst [vmem:[%s3396_s15 + $0x68] sm:$0xff] %v316_v13   ;;  %v324_v15 = vld [vmem:[%s3391_s14 + $0x78] sm:$0xff]   ;;  %v328_v16 = vld [vmem:[%s3391_s14 + $0x100] sm:$0xff]  }
  0x19   : > { %321 = vst [vmem:[%s3396_s15 + $0x70] sm:$0xff] %v320_v14   ;;  %v332_v17 = vld [vmem:[%s3391_s14 + $0x108] sm:$0xff]   ;;  %325 = vst [vmem:[%s3396_s15 + $0x78] sm:$0xff] %v324_v15   ;;  %v336_v18 = vld [vmem:[%s3391_s14 + $0x110] sm:$0xff]  }
  0x1a   : > { %329 = vst [vmem:[%s3396_s15 + $0x80] sm:$0xff] %v328_v16   ;;  %333 = vst [vmem:[%s3396_s15 + $0x88] sm:$0xff] %v332_v17   ;;  %v340_v19 = vld [vmem:[%s3391_s14 + $0x118] sm:$0xff]   ;;  %v344_v20 = vld [vmem:[%s3391_s14 + $0x120] sm:$0xff]  }
  0x1b   : > { %337 = vst [vmem:[%s3396_s15 + $0x90] sm:$0xff] %v336_v18   ;;  %341 = vst [vmem:[%s3396_s15 + $0x98] sm:$0xff] %v340_v19   ;;  %v348_v21 = vld [vmem:[%s3391_s14 + $0x128] sm:$0xff]   ;;  %v352_v22 = vld [vmem:[%s3391_s14 + $0x130] sm:$0xff]  }
  0x1c   : > { %345 = vst [vmem:[%s3396_s15 + $0xa0] sm:$0xff] %v344_v20   ;;  %v356_v23 = vld [vmem:[%s3391_s14 + $0x138] sm:$0xff]   ;;  %349 = vst [vmem:[%s3396_s15 + $0xa8] sm:$0xff] %v348_v21   ;;  %v360_v24 = vld [vmem:[%s3391_s14 + $0x140] sm:$0xff]  }
  0x1d   : > { %353 = vst [vmem:[%s3396_s15 + $0xb0] sm:$0xff] %v352_v22   ;;  %357 = vst [vmem:[%s3396_s15 + $0xb8] sm:$0xff] %v356_v23   ;;  %v364_v25 = vld [vmem:[%s3391_s14 + $0x148] sm:$0xff]   ;;  %v368_v26 = vld [vmem:[%s3391_s14 + $0x150] sm:$0xff]  }
  0x1e   : > { %361 = vst [vmem:[%s3396_s15 + $0xc0] sm:$0xff] %v360_v24   ;;  %365 = vst [vmem:[%s3396_s15 + $0xc8] sm:$0xff] %v364_v25   ;;  %v372_v27 = vld [vmem:[%s3391_s14 + $0x158] sm:$0xff]   ;;  %v376_v28 = vld [vmem:[%s3391_s14 + $0x160] sm:$0xff]  }
  0x1f   : > { %369 = vst [vmem:[%s3396_s15 + $0xd0] sm:$0xff] %v368_v26   ;;  %v380_v29 = vld [vmem:[%s3391_s14 + $0x168] sm:$0xff]   ;;  %373 = vst [vmem:[%s3396_s15 + $0xd8] sm:$0xff] %v372_v27   ;;  %v384_v30 = vld [vmem:[%s3391_s14 + $0x170] sm:$0xff]  }
  0x20   : > { %377 = vst [vmem:[%s3396_s15 + $0xe0] sm:$0xff] %v376_v28   ;;  %381 = vst [vmem:[%s3396_s15 + $0xe8] sm:$0xff] %v380_v29   ;;  %v388_v31 = vld [vmem:[%s3391_s14 + $0x178] sm:$0xff]   ;;  %v392_v32 = vld [vmem:[%s3391_s14 + $0x200] sm:$0xff]  }
  0x21   : > { %385 = vst [vmem:[%s3396_s15 + $0xf0] sm:$0xff] %v384_v30   ;;  %389 = vst [vmem:[%s3396_s15 + $0xf8] sm:$0xff] %v388_v31   ;;  %v396_v33 = vld [vmem:[%s3391_s14 + $0x208] sm:$0xff]   ;;  %v400_v34 = vld [vmem:[%s3391_s14 + $0x210] sm:$0xff]  }
  0x22   : > { %393 = vst [vmem:[%s3396_s15 + $0x100] sm:$0xff] %v392_v32   ;;  %v404_v35 = vld [vmem:[%s3391_s14 + $0x218] sm:$0xff]   ;;  %397 = vst [vmem:[%s3396_s15 + $0x108] sm:$0xff] %v396_v33   ;;  %v408_v36 = vld [vmem:[%s3391_s14 + $0x220] sm:$0xff]  }
  0x23   : > { %401 = vst [vmem:[%s3396_s15 + $0x110] sm:$0xff] %v400_v34   ;;  %405 = vst [vmem:[%s3396_s15 + $0x118] sm:$0xff] %v404_v35   ;;  %v412_v37 = vld [vmem:[%s3391_s14 + $0x228] sm:$0xff]   ;;  %v416_v38 = vld [vmem:[%s3391_s14 + $0x230] sm:$0xff]  }
  0x24   : > { %409 = vst [vmem:[%s3396_s15 + $0x120] sm:$0xff] %v408_v36   ;;  %413 = vst [vmem:[%s3396_s15 + $0x128] sm:$0xff] %v412_v37   ;;  %v420_v39 = vld [vmem:[%s3391_s14 + $0x238] sm:$0xff]   ;;  %v424_v40 = vld [vmem:[%s3391_s14 + $0x240] sm:$0xff]  }
  0x25   : > { %417 = vst [vmem:[%s3396_s15 + $0x130] sm:$0xff] %v416_v38   ;;  %v428_v41 = vld [vmem:[%s3391_s14 + $0x248] sm:$0xff]   ;;  %421 = vst [vmem:[%s3396_s15 + $0x138] sm:$0xff] %v420_v39   ;;  %v432_v42 = vld [vmem:[%s3391_s14 + $0x250] sm:$0xff]  }
  0x26   : > { %425 = vst [vmem:[%s3396_s15 + $0x140] sm:$0xff] %v424_v40   ;;  %429 = vst [vmem:[%s3396_s15 + $0x148] sm:$0xff] %v428_v41   ;;  %v436_v43 = vld [vmem:[%s3391_s14 + $0x258] sm:$0xff]   ;;  %v440_v44 = vld [vmem:[%s3391_s14 + $0x260] sm:$0xff]  }
  0x27   : > { %433 = vst [vmem:[%s3396_s15 + $0x150] sm:$0xff] %v432_v42   ;;  %437 = vst [vmem:[%s3396_s15 + $0x158] sm:$0xff] %v436_v43   ;;  %v444_v45 = vld [vmem:[%s3391_s14 + $0x268] sm:$0xff]   ;;  %v448_v46 = vld [vmem:[%s3391_s14 + $0x270] sm:$0xff]  }
  0x28   : > { %441 = vst [vmem:[%s3396_s15 + $0x160] sm:$0xff] %v440_v44   ;;  %v452_v47 = vld [vmem:[%s3391_s14 + $0x278] sm:$0xff]   ;;  %445 = vst [vmem:[%s3396_s15 + $0x168] sm:$0xff] %v444_v45   ;;  %v456_v48 = vld [vmem:[%s3391_s14 + $0x300] sm:$0xff]  }
  0x29   : > { %449 = vst [vmem:[%s3396_s15 + $0x170] sm:$0xff] %v448_v46   ;;  %453 = vst [vmem:[%s3396_s15 + $0x178] sm:$0xff] %v452_v47   ;;  %v460_v49 = vld [vmem:[%s3391_s14 + $0x308] sm:$0xff]   ;;  %v464_v50 = vld [vmem:[%s3391_s14 + $0x310] sm:$0xff]  }
  0x2a   : > { %457 = vst [vmem:[%s3396_s15 + $0x180] sm:$0xff] %v456_v48   ;;  %461 = vst [vmem:[%s3396_s15 + $0x188] sm:$0xff] %v460_v49   ;;  %v468_v51 = vld [vmem:[%s3391_s14 + $0x318] sm:$0xff]   ;;  %v472_v52 = vld [vmem:[%s3391_s14 + $0x320] sm:$0xff]  }
  0x2b   : > { %465 = vst [vmem:[%s3396_s15 + $0x190] sm:$0xff] %v464_v50   ;;  %v476_v53 = vld [vmem:[%s3391_s14 + $0x328] sm:$0xff]   ;;  %469 = vst [vmem:[%s3396_s15 + $0x198] sm:$0xff] %v468_v51   ;;  %v480_v54 = vld [vmem:[%s3391_s14 + $0x330] sm:$0xff]  }
  0x2c   : > { %473 = vst [vmem:[%s3396_s15 + $0x1a0] sm:$0xff] %v472_v52   ;;  %477 = vst [vmem:[%s3396_s15 + $0x1a8] sm:$0xff] %v476_v53   ;;  %v484_v55 = vld [vmem:[%s3391_s14 + $0x338] sm:$0xff]   ;;  %v488_v56 = vld [vmem:[%s3391_s14 + $0x340] sm:$0xff]  }
  0x2d   : > { %481 = vst [vmem:[%s3396_s15 + $0x1b0] sm:$0xff] %v480_v54   ;;  %485 = vst [vmem:[%s3396_s15 + $0x1b8] sm:$0xff] %v484_v55   ;;  %v492_v57 = vld [vmem:[%s3391_s14 + $0x348] sm:$0xff]   ;;  %v496_v58 = vld [vmem:[%s3391_s14 + $0x350] sm:$0xff]  }
  0x2e   : > { %489 = vst [vmem:[%s3396_s15 + $0x1c0] sm:$0xff] %v488_v56   ;;  %v500_v59 = vld [vmem:[%s3391_s14 + $0x358] sm:$0xff]   ;;  %493 = vst [vmem:[%s3396_s15 + $0x1c8] sm:$0xff] %v492_v57   ;;  %v504_v60 = vld [vmem:[%s3391_s14 + $0x360] sm:$0xff]  }
  0x2f   : > { %497 = vst [vmem:[%s3396_s15 + $0x1d0] sm:$0xff] %v496_v58   ;;  %501 = vst [vmem:[%s3396_s15 + $0x1d8] sm:$0xff] %v500_v59   ;;  %v508_v61 = vld [vmem:[%s3391_s14 + $0x368] sm:$0xff]   ;;  %v512_v62 = vld [vmem:[%s3391_s14 + $0x370] sm:$0xff]  }
  0x30   : > { %505 = vst [vmem:[%s3396_s15 + $0x1e0] sm:$0xff] %v504_v60   ;;  %509 = vst [vmem:[%s3396_s15 + $0x1e8] sm:$0xff] %v508_v61   ;;  %v516_v63 = vld [vmem:[%s3391_s14 + $0x378] sm:$0xff]  }
  0x31   : > { %513 = vst [vmem:[%s3396_s15 + $0x1f0] sm:$0xff] %v512_v62   ;;  %517 = vst [vmem:[%s3396_s15 + $0x1f8] sm:$0xff] %v516_v63  }
  0x32 PF: > { %p2412_p5 = scmp.ge.s32.totalorder %s3315_s26, 1  ;;  %p797_p6 = scmp.lt.s32.totalorder %s3315_s26, 3 }
  0x34   : > { %p798_p7 = pnand %p2412_p5, %p797_p6 }
  0x35   : > { %v1290_v0 = vld [vmem:[%s4017_s3] sm:$0x3] (!%p798_p7)  ;;  %vm1340_vm0 = vcmask (!%p798_p7), 1041408   ;;  %s804_s18 = sand.u32 (!%p798_p7), 1, %s3307_s24   ;;  %s2414_s19 = sshll.u32 (!%p798_p7), %s2405_s27, 5  ;;  %vm1291_vm1 = vcmask (!%p798_p7), 31744  }
  0x36   : > { %801 = sbr.rel (%p798_p7) target bundleno = 631 (0x277), region = 85  ;;  %3121 = vmatprep.subr.msk.bf16.mxu0 (!%p798_p7), %vm1340_vm0, %v1290_v0  ;;  %v1342_v1 = vsel (!%p798_p7), %vm1340_vm0, %v1290_v0, 0  ;;  %s2413_s20 = sshll.u32 (!%p798_p7), %s804_s18, 9  ;;  %v1273_v2 = vld [vmem:[%s4016_s2] sm:$0x3] (!%p798_p7)  ;;  %3122 = vmatprep.subr.msk.bf16.mxu1 (!%p798_p7), %vm1340_vm0, %v1290_v0  ;;  %vm2133_vm2 = vcmask (!%p798_p7), 1043456  }
  0x37   : > { %p841_p8 = scmp.lt.s32.totalorder (!%p798_p7), %s2414_s19, 63  ;;  %2986 = vmatpush3.bf16.msra.mxu0 (!%p798_p7), %v1342_v1  ;;  %3088 = vmatpush3.bf16.msra.mxu1 (!%p798_p7), %v1342_v1  ;;  %s3537_s23 = scalar_lea.vmem (!%p798_p7), [#allocation2], %s2413_s20  ;;  %v3544_v6 = vsel (!%p798_p7), %vm1340_vm0, %v1273_v2, 0  ;;  %vm2084_vm3 = vcmask (!%p798_p7), 64512   ;;  %vm2298_vm4 = vcmask (!%p798_p7), 15360  }
  0x38   : > { %v2616_v3 = vld [vmem:[%s3537_s23] sm:$0xff] (!%p798_p7)   ;;  %3123 = vmatprep.subr.msk.bf16.mxu0 (!%p798_p7), %vm1340_vm0, %v1273_v2  ;;  %v2871_v12 = vld [vmem:[%s3537_s23 + $0x8] sm:$0xff] (!%p798_p7)   ;;  %v2872_v24 = vld [vmem:[%s3537_s23 + $0x10] sm:$0xff] (!%p798_p7)  }
  0x39   : > { %v2886_v4 = vld [vmem:[%s3537_s23 + $0x80] sm:$0xff] (!%p798_p7)   ;;  %v2617_v7 = vunpack.c.l.bf16 (!%p798_p7), %v2616_v3  ;;  %v2618_v8 = vunpack.c.h.bf16 (!%p798_p7), %v2616_v3  ;;  %v2887_v13 = vld [vmem:[%s3537_s23 + $0x88] sm:$0xff] (!%p798_p7)   ;;  %v2621_v22 = vunpack.c.l.bf16 (!%p798_p7), %v2871_v12  ;;  %v2622_v23 = vunpack.c.h.bf16 (!%p798_p7), %v2871_v12  ;;  %v2888_v29 = vld [vmem:[%s3537_s23 + $0x90] sm:$0xff] (!%p798_p7)  }
  0x3a   : > { %v2902_v5 = vld [vmem:[%s3537_s23 + $0x100] sm:$0xff] (!%p798_p7)   ;;  %v2681_v9 = vunpack.c.l.bf16 (!%p798_p7), %v2886_v4  ;;  %v2682_v10 = vunpack.c.h.bf16 (!%p798_p7), %v2886_v4  ;;  %v2903_v18 = vld [vmem:[%s3537_s23 + $0x108] sm:$0xff] (!%p798_p7)   ;;  %v2685_v25 = vunpack.c.l.bf16 (!%p798_p7), %v2887_v13  ;;  %v2686_v26 = vunpack.c.h.bf16 (!%p798_p7), %v2887_v13  ;;  %v2904_v34 = vld [vmem:[%s3537_s23 + $0x110] sm:$0xff] (!%p798_p7)  }
  0x3b   : > { %v2918_v11 = vld [vmem:[%s3537_s23 + $0x180] sm:$0xff] (!%p798_p7)   ;;  %v2745_v14 = vunpack.c.l.bf16 (!%p798_p7), %v2902_v5  ;;  %v2746_v15 = vunpack.c.h.bf16 (!%p798_p7), %v2902_v5  ;;  %v2919_v19 = vld [vmem:[%s3537_s23 + $0x188] sm:$0xff] (!%p798_p7)   ;;  %v2749_v27 = vunpack.c.l.bf16 (!%p798_p7), %v2903_v18  ;;  %v2750_v28 = vunpack.c.h.bf16 (!%p798_p7), %v2903_v18  ;;  %v2920_v43 = vld [vmem:[%s3537_s23 + $0x190] sm:$0xff] (!%p798_p7)  }
  0x3c   : > { %v2809_v16 = vunpack.c.l.bf16 (!%p798_p7), %v2918_v11  ;;  %v2810_v17 = vunpack.c.h.bf16 (!%p798_p7), %v2918_v11  ;;  %v983_v20 = vadd.f32 (!%p798_p7), %v2681_v9, %v2617_v7  ;;  %v984_v21 = vadd.f32 (!%p798_p7), %v2682_v10, %v2618_v8  ;;  %v2873_v48 = vld [vmem:[%s3537_s23 + $0x18] sm:$0xff] (!%p798_p7)   ;;  %v2874_v4 = vld [vmem:[%s3537_s23 + $0x20] sm:$0xff] (!%p798_p7)  }
  0x3d   : > { %s4026_s19 = smov (!%p841_p8, %s2414_s19), 63  ;;  %v2813_v32 = vunpack.c.l.bf16 %v2919_v19  ;;  %v2814_v33 = vunpack.c.h.bf16 %v2919_v19  ;;  %v985_v35 = vadd.f32 %v2685_v25, %v2621_v22  ;;  %v986_v36 = vadd.f32 %v2686_v26, %v2622_v23  ;;  %v2889_v53 = vld [vmem:[%s3537_s23 + $0x98] sm:$0xff]   ;;  %v2890_v5 = vld [vmem:[%s3537_s23 + $0xa0] sm:$0xff]  }
  0x3e   : > { %v1080_v30 = vadd.f32 %v2745_v14, %v983_v20  ;;  %v1081_v31 = vadd.f32 %v2746_v15, %v984_v21  ;;  %v2625_v37 = vunpack.c.l.bf16 %v2872_v24  ;;  %v2626_v38 = vunpack.c.h.bf16 %v2872_v24  ;;  %s2415_s24 = sshll.u32 %s4026_s19, 2  ;;  %v2905_v58 = vld [vmem:[%s3537_s23 + $0x118] sm:$0xff]   ;;  %v2906_v15 = vld [vmem:[%s3537_s23 + $0x120] sm:$0xff]   ;;  %v2875_v21 = vld [vmem:[%s3537_s23 + $0x28] sm:$0xff]   ;;  %s2417_s12 = sshll.u32 %s4026_s19, 3 }
  0x3f   : > { %v2689_v41 = vunpack.c.l.bf16 %v2888_v29  ;;  %v2690_v42 = vunpack.c.h.bf16 %v2888_v29  ;;  %v1082_v44 = vadd.f32 %v2749_v27, %v985_v35  ;;  %v1083_v45 = vadd.f32 %v2750_v28, %v986_v36  ;;  %s3564_s29 = scalar_lea.vmem %s4014_s0, %s2415_s24  ;;  %v2921_v63 = vld [vmem:[%s3537_s23 + $0x198] sm:$0xff]   ;;  %v2922_v20 = vld [vmem:[%s3537_s23 + $0x1a0] sm:$0xff]   ;;  %v2907_v35 = vld [vmem:[%s3537_s23 + $0x128] sm:$0xff]   ;;  %s3906_s17 = scalar_lea.vmem %s4021_s7, %s2417_s12 }
  0x40   : > { %v1177_v39 = vadd.f32 %v2809_v16, %v1080_v30  ;;  %v1178_v40 = vadd.f32 %v2810_v17, %v1081_v31  ;;  %v2753_v46 = vunpack.c.l.bf16 %v2904_v34  ;;  %v2754_v47 = vunpack.c.h.bf16 %v2904_v34  ;;  %v2891_v30 = vld [vmem:[%s3537_s23 + $0xa8] sm:$0xff]  }
  0x41   : > { %v987_v51 = vadd.f32 %v2689_v41, %v2625_v37  ;;  %v988_v52 = vadd.f32 %v2690_v42, %v2626_v38  ;;  %v1179_v54 = vadd.f32 %v2813_v32, %v1082_v44  ;;  %v1180_v55 = vadd.f32 %v2814_v33, %v1083_v45 }
  0x42   : > { %v1209_v49 = vmul.f32 0.25, %v1177_v39  ;;  %v1210_v50 = vmul.f32 0.25, %v1178_v40  ;;  %v2817_v56 = vunpack.c.l.bf16 %v2920_v43  ;;  %v2818_v57 = vunpack.c.h.bf16 %v2920_v43 }
  0x43   : > { %v1084_v60 = vadd.f32 %v2753_v46, %v987_v51  ;;  %v1085_v61 = vadd.f32 %v2754_v47, %v988_v52  ;;  %v2629_v62 = vunpack.c.l.bf16 %v2873_v48  ;;  %v1211_v0 = vmul.f32 0.25, %v1179_v54 }
  0x44   : > { %v1274_v59 = vpack.c.bf16 %v1210_v50, %v1209_v49  ;;  %v1212_v1 = vmul.f32 0.25, %v1180_v55  ;;  %v2630_v2 = vunpack.c.h.bf16 %v2873_v48  ;;  %v2693_v3 = vunpack.c.l.bf16 %v2889_v53  ;;  %v2876_v48 = vld [vmem:[%s3537_s23 + $0x30] sm:$0xff]  }
  0x45   : > { %v1181_v7 = vadd.f32 %v2817_v56, %v1084_v60  ;;  %v1182_v8 = vadd.f32 %v2818_v57, %v1085_v61  ;;  %v2694_v9 = vunpack.c.h.bf16 %v2889_v53  ;;  %v2757_v10 = vunpack.c.l.bf16 %v2905_v58  ;;  %v2892_v53 = vld [vmem:[%s3537_s23 + $0xb0] sm:$0xff]  }
  0x46   : > { %2987 = vmatprep.mubr.msk.bf16.mxu0 %vm1291_vm1, %v1274_v59  ;;  %v1275_v11 = vpack.c.bf16 %v1212_v1, %v1211_v0  ;;  %v989_v12 = vadd.f32 %v2693_v3, %v2629_v62  ;;  %v2758_v13 = vunpack.c.h.bf16 %v2905_v58  ;;  %v2821_v14 = vunpack.c.l.bf16 %v2921_v63  ;;  %v2908_v58 = vld [vmem:[%s3537_s23 + $0x130] sm:$0xff]  }
  0x47   : > { %v1213_v16 = vmul.f32 0.25, %v1181_v7  ;;  %v1214_v17 = vmul.f32 0.25, %v1182_v8  ;;  %v990_v18 = vadd.f32 %v2694_v9, %v2630_v2  ;;  %v2822_v19 = vunpack.c.h.bf16 %v2921_v63  ;;  %v2924_v59 = vld [vmem:[%s3537_s23 + $0x1b0] sm:$0xff]  }
  0x48   : > { %2988 = vmatmul.mubr.msk.bf16.vlgmr.msra.gmra.mrb[0].mxu0 %vm1291_vm1, %v1275_v11  ;;  %v1086_v22 = vadd.f32 %v2757_v10, %v989_v12  ;;  %v2633_v23 = vunpack.c.l.bf16 %v2874_v4  ;;  %v2634_v24 = vunpack.c.h.bf16 %v2874_v4  ;;  %v2697_v25 = vunpack.c.l.bf16 %v2890_v5  ;;  %v2877_v4 = vld [vmem:[%s3537_s23 + $0x38] sm:$0xff]  }
  0x49   : > { %3020 = vmatpush3.bf16.msra.mxu0 %v3544_v6  ;;  %v1276_v26 = vpack.c.bf16 %v1214_v17, %v1213_v16  ;;  %v1087_v27 = vadd.f32 %v2758_v13, %v990_v18  ;;  %v2698_v28 = vunpack.c.h.bf16 %v2890_v5  ;;  %v2761_v29 = vunpack.c.l.bf16 %v2906_v15  ;;  %v2923_v6 = vld [vmem:[%s3537_s23 + $0x1a8] sm:$0xff]   ;;  %v2893_v5 = vld [vmem:[%s3537_s23 + $0xb8] sm:$0xff]  }
  0x4a   : > { %v1183_v31 = vadd.f32 %v2821_v14, %v1086_v22  ;;  %v991_v32 = vadd.f32 %v2697_v25, %v2633_v23  ;;  %v2762_v33 = vunpack.c.h.bf16 %v2906_v15  ;;  %v2825_v34 = vunpack.c.l.bf16 %v2922_v20  ;;  %v2909_v11 = vld [vmem:[%s3537_s23 + $0x138] sm:$0xff]   ;;  %v2878_v25 = vld [vmem:[%s3537_s23 + $0x40] sm:$0xff]  }
  0x4b   : > { %2991 = vmatprep.mubr.msk.bf16.mxu0 %vm1291_vm1, %v1276_v26  ;;  %v1184_v36 = vadd.f32 %v2822_v19, %v1087_v27  ;;  %v992_v37 = vadd.f32 %v2698_v28, %v2634_v24  ;;  %v2826_v38 = vunpack.c.h.bf16 %v2922_v20  ;;  %v2637_v39 = vunpack.c.l.bf16 %v2875_v21  ;;  %v2925_v16 = vld [vmem:[%s3537_s23 + $0x1b8] sm:$0xff]  }
  0x4c   : > { %v1215_v40 = vmul.f32 0.25, %v1183_v31  ;;  %v1088_v41 = vadd.f32 %v2761_v29, %v991_v32  ;;  %v2638_v42 = vunpack.c.h.bf16 %v2875_v21  ;;  %v2701_v43 = vunpack.c.l.bf16 %v2891_v30 }
  0x4d   : > { %v1216_v44 = vmul.f32 0.25, %v1184_v36  ;;  %v1089_v45 = vadd.f32 %v2762_v33, %v992_v37  ;;  %v2702_v46 = vunpack.c.h.bf16 %v2891_v30  ;;  %v2765_v47 = vunpack.c.l.bf16 %v2907_v35  ;;  %v2894_v30 = vld [vmem:[%s3537_s23 + $0xc0] sm:$0xff]  }
  0x4e   : > { %v1185_v49 = vadd.f32 %v2825_v34, %v1088_v41  ;;  %v993_v50 = vadd.f32 %v2701_v43, %v2637_v39  ;;  %v2766_v51 = vunpack.c.h.bf16 %v2907_v35  ;;  %v2829_v52 = vunpack.c.l.bf16 %v2923_v6  ;;  %v2910_v35 = vld [vmem:[%s3537_s23 + $0x140] sm:$0xff]  }
  0x4f   : > { %v1277_v54 = vpack.c.bf16 %v1216_v44, %v1215_v40  ;;  %v1186_v55 = vadd.f32 %v2826_v38, %v1089_v45  ;;  %v994_v56 = vadd.f32 %v2702_v46, %v2638_v42  ;;  %v2830_v57 = vunpack.c.h.bf16 %v2923_v6  ;;  %v2926_v6 = vld [vmem:[%s3537_s23 + $0x1c0] sm:$0xff]   ;;  %v2879_v44 = vld [vmem:[%s3537_s23 + $0x48] sm:$0xff]  }
  0x50   : > { %v1217_v60 = vmul.f32 0.25, %v1185_v49  ;;  %v1090_v61 = vadd.f32 %v2765_v47, %v993_v50  ;;  %v2641_v62 = vunpack.c.l.bf16 %v2876_v48  ;;  %v2642_v63 = vunpack.c.h.bf16 %v2876_v48  ;;  %v2895_v49 = vld [vmem:[%s3537_s23 + $0xc8] sm:$0xff]  }
  0x51   : > { %2992 = vmatmul.mubr.msk.bf16.gmra.mrb[4].mxu0 %vm1291_vm1, %v1277_v54  ;;  %v1218_v0 = vmul.f32 0.25, %v1186_v55  ;;  %v1091_v1 = vadd.f32 %v2766_v51, %v994_v56  ;;  %v2705_v2 = vunpack.c.l.bf16 %v2892_v53  ;;  %v2706_v3 = vunpack.c.h.bf16 %v2892_v53  ;;  %v2911_v54 = vld [vmem:[%s3537_s23 + $0x148] sm:$0xff]  }
  0x52   : > { %v1187_v7 = vadd.f32 %v2829_v52, %v1090_v61  ;;  %v2769_v8 = vunpack.c.l.bf16 %v2908_v58  ;;  %v2770_v9 = vunpack.c.h.bf16 %v2908_v58  ;;  %v2833_v10 = vunpack.c.l.bf16 %v2924_v59 }
  0x53   : > { %v1278_v12 = vpack.c.bf16 %v1218_v0, %v1217_v60  ;;  %v1188_v13 = vadd.f32 %v2830_v57, %v1091_v1  ;;  %v995_v14 = vadd.f32 %v2705_v2, %v2641_v62  ;;  %v996_v15 = vadd.f32 %v2706_v3, %v2642_v63 }
  0x54   : > { %v1219_v17 = vmul.f32 0.25, %v1187_v7  ;;  %v2834_v18 = vunpack.c.h.bf16 %v2924_v59  ;;  %v2645_v19 = vunpack.c.l.bf16 %v2877_v4  ;;  %v2646_v20 = vunpack.c.h.bf16 %v2877_v4  ;;  %v2927_v59 = vld [vmem:[%s3537_s23 + $0x1c8] sm:$0xff]   ;;  %v2880_v4 = vld [vmem:[%s3537_s23 + $0x50] sm:$0xff]  }
  0x55   : > { %2995 = vmatprep.mubr.msk.bf16.mxu0 %vm1291_vm1, %v1278_v12  ;;  %v1220_v21 = vmul.f32 0.25, %v1188_v13  ;;  %v1092_v22 = vadd.f32 %v2769_v8, %v995_v14  ;;  %v1093_v23 = vadd.f32 %v2770_v9, %v996_v15  ;;  %v2709_v24 = vunpack.c.l.bf16 %v2893_v5 }
  0x56   : > { %v2710_v26 = vunpack.c.h.bf16 %v2893_v5  ;;  %v2773_v27 = vunpack.c.l.bf16 %v2909_v11  ;;  %v2774_v28 = vunpack.c.h.bf16 %v2909_v11  ;;  %v2837_v29 = vunpack.c.l.bf16 %v2925_v16  ;;  %v3149_v5 = vld [vmem:[%s3564_s29] sm:$0xff]   ;;  %v2896_v11 = vld [vmem:[%s3537_s23 + $0xd0] sm:$0xff]  }
  0x57   : > { %v1279_v31 = vpack.c.bf16 %v1220_v21, %v1219_v17  ;;  %v1189_v32 = vadd.f32 %v2833_v10, %v1092_v22  ;;  %v1190_v33 = vadd.f32 %v2834_v18, %v1093_v23  ;;  %v997_v34 = vadd.f32 %v2709_v24, %v2645_v19  ;;  %v2928_v17 = vld [vmem:[%s3537_s23 + $0x1d0] sm:$0xff]  }
  0x58   : > { %v998_v36 = vadd.f32 %v2710_v26, %v2646_v20  ;;  %v2838_v37 = vunpack.c.h.bf16 %v2925_v16  ;;  %v2649_v38 = vunpack.c.l.bf16 %v2878_v25  ;;  %v2650_v39 = vunpack.c.h.bf16 %v2878_v25  ;;  %v2912_v16 = vld [vmem:[%s3537_s23 + $0x150] sm:$0xff]   ;;  %v2881_v26 = vld [vmem:[%s3537_s23 + $0x58] sm:$0xff]  }
  0x59   : > { %2996 = vmatmul.mubr.msk.bf16.gmra.mrb[8].mxu0 %vm1291_vm1, %v1279_v31  ;;  %v1221_v40 = vmul.f32 0.25, %v1189_v32  ;;  %v1222_v41 = vmul.f32 0.25, %v1190_v33  ;;  %v1094_v42 = vadd.f32 %v2773_v27, %v997_v34  ;;  %v2713_v43 = vunpack.c.l.bf16 %v2894_v30  ;;  %v2897_v31 = vld [vmem:[%s3537_s23 + $0xd8] sm:$0xff]  }
  0x5a   : > { %v1095_v45 = vadd.f32 %v2774_v28, %v998_v36  ;;  %v2714_v46 = vunpack.c.h.bf16 %v2894_v30  ;;  %v2777_v47 = vunpack.c.l.bf16 %v2910_v35  ;;  %v2778_v48 = vunpack.c.h.bf16 %v2910_v35  ;;  %v2913_v36 = vld [vmem:[%s3537_s23 + $0x158] sm:$0xff]  }
  0x5b   : > { %v1280_v50 = vpack.c.bf16 %v1222_v41, %v1221_v40  ;;  %v1191_v51 = vadd.f32 %v2837_v29, %v1094_v42  ;;  %v999_v52 = vadd.f32 %v2713_v43, %v2649_v38  ;;  %v2841_v53 = vunpack.c.l.bf16 %v2926_v6  ;;  %v3150_v41 = vld [vmem:[%s3564_s29 + $0x8] sm:$0xff]  }
  0x5c   : > { %v1192_v55 = vadd.f32 %v2838_v37, %v1095_v45  ;;  %v1000_v56 = vadd.f32 %v2714_v46, %v2650_v39  ;;  %v2842_v57 = vunpack.c.h.bf16 %v2926_v6  ;;  %v2653_v58 = vunpack.c.l.bf16 %v2879_v44  ;;  %v2929_v37 = vld [vmem:[%s3537_s23 + $0x1d8] sm:$0xff]   ;;  %v2882_v46 = vld [vmem:[%s3537_s23 + $0x60] sm:$0xff]  }
  0x5d   : > { %2999 = vmatprep.mubr.msk.bf16.mxu0 %vm1291_vm1, %v1280_v50  ;;  %v1223_v60 = vmul.f32 0.25, %v1191_v51  ;;  %v1096_v61 = vadd.f32 %v2777_v47, %v999_v52  ;;  %v2654_v62 = vunpack.c.h.bf16 %v2879_v44  ;;  %v2717_v63 = vunpack.c.l.bf16 %v2895_v49  ;;  %v3151_v47 = vld [vmem:[%s3564_s29 + $0x10] sm:$0xff]   ;;  %v2898_v52 = vld [vmem:[%s3537_s23 + $0xe0] sm:$0xff]  }
  0x5e   : > { %v1224_v0 = vmul.f32 0.25, %v1192_v55  ;;  %v1097_v1 = vadd.f32 %v2778_v48, %v1000_v56  ;;  %v2718_v2 = vunpack.c.h.bf16 %v2895_v49  ;;  %v2781_v3 = vunpack.c.l.bf16 %v2911_v54 }
  0x5f   : > { %v1193_v7 = vadd.f32 %v2841_v53, %v1096_v61  ;;  %v1001_v8 = vadd.f32 %v2717_v63, %v2653_v58  ;;  %v2782_v9 = vunpack.c.h.bf16 %v2911_v54  ;;  %v2845_v10 = vunpack.c.l.bf16 %v2927_v59 }
  0x60   : > { %v1281_v12 = vpack.c.bf16 %v1224_v0, %v1223_v60  ;;  %v1194_v13 = vadd.f32 %v2842_v57, %v1097_v1  ;;  %v1002_v14 = vadd.f32 %v2718_v2, %v2654_v62  ;;  %v2846_v15 = vunpack.c.h.bf16 %v2927_v59  ;;  %v2914_v57 = vld [vmem:[%s3537_s23 + $0x160] sm:$0xff]  }
  0x61   : > { %v1225_v18 = vmul.f32 0.25, %v1193_v7  ;;  %v1098_v19 = vadd.f32 %v2781_v3, %v1001_v8  ;;  %v2657_v20 = vunpack.c.l.bf16 %v2880_v4  ;;  %v2658_v21 = vunpack.c.h.bf16 %v2880_v4  ;;  %v2930_v62 = vld [vmem:[%s3537_s23 + $0x1e0] sm:$0xff]   ;;  %v2883_v3 = vld [vmem:[%s3537_s23 + $0x68] sm:$0xff]  }
  0x62   : > { %3000 = vmatmul.mubr.msk.bf16.gmra.mrb[12].mxu0 %vm1291_vm1, %v1281_v12  ;;  %v1226_v22 = vmul.f32 0.25, %v1194_v13  ;;  %v1099_v23 = vadd.f32 %v2782_v9, %v1002_v14  ;;  %v2721_v24 = vunpack.c.l.bf16 %v2896_v11  ;;  %v2722_v25 = vunpack.c.h.bf16 %v2896_v11  ;;  %v2899_v9 = vld [vmem:[%s3537_s23 + $0xe8] sm:$0xff]  }
  0x63   : > { %3021 = vmatprep.mubr.msk.bf16.mxu0 %vm1291_vm1, %v3149_v5  ;;  %v1195_v27 = vadd.f32 %v2845_v10, %v1098_v19  ;;  %v2785_v28 = vunpack.c.l.bf16 %v2912_v16  ;;  %v2786_v29 = vunpack.c.h.bf16 %v2912_v16  ;;  %v2849_v30 = vunpack.c.l.bf16 %v2928_v17  ;;  %v2915_v14 = vld [vmem:[%s3537_s23 + $0x168] sm:$0xff]  }
  0x64   : > { %v1282_v32 = vpack.c.bf16 %v1226_v22, %v1225_v18  ;;  %v1196_v33 = vadd.f32 %v2846_v15, %v1099_v23  ;;  %v1003_v34 = vadd.f32 %v2721_v24, %v2657_v20  ;;  %v1004_v35 = vadd.f32 %v2722_v25, %v2658_v21  ;;  %v2931_v19 = vld [vmem:[%s3537_s23 + $0x1e8] sm:$0xff]   ;;  %v3152_v20 = vld [vmem:[%s3564_s29 + $0x18] sm:$0xff]   ;;  %v3153_v25 = vld [vmem:[%s3564_s29 + $0x20] sm:$0xff]  }
  0x65   : > { %v1227_v38 = vmul.f32 0.25, %v1195_v27  ;;  %v2850_v39 = vunpack.c.h.bf16 %v2928_v17  ;;  %v2661_v6 = vunpack.c.l.bf16 %v2881_v26  ;;  %v2662_v40 = vunpack.c.h.bf16 %v2881_v26 }
  0x66   : > { %3003 = vmatprep.mubr.msk.bf16.mxu1 %vm1291_vm1, %v1282_v32  ;;  %v1228_v42 = vmul.f32 0.25, %v1196_v33  ;;  %v1100_v43 = vadd.f32 %v2785_v28, %v1003_v34  ;;  %v1101_v44 = vadd.f32 %v2786_v29, %v1004_v35  ;;  %v2725_v45 = vunpack.c.l.bf16 %v2897_v31  ;;  %v2900_v35 = vld [vmem:[%s3537_s23 + $0xf0] sm:$0xff]  }
  0x67   : > { %v2726_v48 = vunpack.c.h.bf16 %v2897_v31  ;;  %v2789_v49 = vunpack.c.l.bf16 %v2913_v36  ;;  %v2790_v50 = vunpack.c.h.bf16 %v2913_v36  ;;  %v2853_v51 = vunpack.c.l.bf16 %v2929_v37 }
  0x68   : > { %v1283_v53 = vpack.c.bf16 %v1228_v42, %v1227_v38  ;;  %v1197_v54 = vadd.f32 %v2849_v30, %v1100_v43  ;;  %v1198_v55 = vadd.f32 %v2850_v39, %v1101_v44  ;;  %v1005_v56 = vadd.f32 %v2725_v45, %v2661_v6  ;;  %v2884_v30 = vld [vmem:[%s3537_s23 + $0x70] sm:$0xff]  }
  0x69   : > { %v1006_v58 = vadd.f32 %v2726_v48, %v2662_v40  ;;  %v2854_v59 = vunpack.c.h.bf16 %v2929_v37  ;;  %v2665_v60 = vunpack.c.l.bf16 %v2882_v46  ;;  %v2666_v61 = vunpack.c.h.bf16 %v2882_v46  ;;  %v2916_v6 = vld [vmem:[%s3537_s23 + $0x170] sm:$0xff]  }
  0x6a   : > { %3022 = vmatmul.mubr.msk.bf16.vlgmr.msra.gmra.mrb[0].mxu0 %vm1291_vm1, %v3150_v41  ;;  %3004 = vmatmul.mubr.msk.bf16.vlgmr.msra.gmra.mrb[0].mxu1 %vm1291_vm1, %v1283_v53  ;;  %v1229_v63 = vmul.f32 0.25, %v1197_v54  ;;  %v1230_v0 = vmul.f32 0.25, %v1198_v55  ;;  %v1102_v1 = vadd.f32 %v2789_v49, %v1005_v56  ;;  %v2729_v2 = vunpack.c.l.bf16 %v2898_v52  ;;  %v2932_v40 = vld [vmem:[%s3537_s23 + $0x1f0] sm:$0xff]   ;;  %v2885_v49 = vld [vmem:[%s3537_s23 + $0x78] sm:$0xff]  }
  0x6b   : > { %3025 = vmatprep.mubr.msk.bf16.mxu0 %vm1291_vm1, %v3151_v47  ;;  %v1103_v4 = vadd.f32 %v2790_v50, %v1006_v58  ;;  %v2730_v5 = vunpack.c.h.bf16 %v2898_v52  ;;  %v2793_v7 = vunpack.c.l.bf16 %v2914_v57  ;;  %v2794_v8 = vunpack.c.h.bf16 %v2914_v57  ;;  %v2901_v54 = vld [vmem:[%s3537_s23 + $0xf8] sm:$0xff]  }
  0x6c   : > { %v1284_v10 = vpack.c.bf16 %v1230_v0, %v1229_v63  ;;  %v1199_v11 = vadd.f32 %v2853_v51, %v1102_v1  ;;  %v1007_v12 = vadd.f32 %v2729_v2, %v2665_v60  ;;  %v2857_v13 = vunpack.c.l.bf16 %v2930_v62  ;;  %v2933_v60 = vld [vmem:[%s3537_s23 + $0x1f8] sm:$0xff]   ;;  %v3155_v2 = vld [vmem:[%s3564_s29 + $0x30] sm:$0xff]  }
  0x6d   : > { %v1200_v15 = vadd.f32 %v2854_v59, %v1103_v4  ;;  %v1008_v16 = vadd.f32 %v2730_v5, %v2666_v61  ;;  %v2858_v17 = vunpack.c.h.bf16 %v2930_v62  ;;  %v2669_v18 = vunpack.c.l.bf16 %v2883_v3  ;;  %v2917_v59 = vld [vmem:[%s3537_s23 + $0x178] sm:$0xff]   ;;  %v3154_v61 = vld [vmem:[%s3564_s29 + $0x28] sm:$0xff]  }
  0x6e   : > { %3007 = vmatprep.mubr.msk.bf16.mxu1 %vm1291_vm1, %v1284_v10  ;;  %v1231_v21 = vmul.f32 0.25, %v1199_v11  ;;  %v1104_v22 = vadd.f32 %v2793_v7, %v1007_v12  ;;  %v2670_v23 = vunpack.c.h.bf16 %v2883_v3  ;;  %v2733_v24 = vunpack.c.l.bf16 %v2899_v9 }
  0x6f   : > { %v1232_v26 = vmul.f32 0.25, %v1200_v15  ;;  %v1105_v27 = vadd.f32 %v2794_v8, %v1008_v16  ;;  %v2734_v28 = vunpack.c.h.bf16 %v2899_v9  ;;  %v2797_v29 = vunpack.c.l.bf16 %v2915_v14 }
  0x70   : > { %v1201_v31 = vadd.f32 %v2857_v13, %v1104_v22  ;;  %v1009_v32 = vadd.f32 %v2733_v24, %v2669_v18  ;;  %v2798_v33 = vunpack.c.h.bf16 %v2915_v14  ;;  %v2861_v34 = vunpack.c.l.bf16 %v2931_v19  ;;  %v3156_v24 = vld [vmem:[%s3564_s29 + $0x38] sm:$0xff]  }
  0x71   : > { %v1285_v36 = vpack.c.bf16 %v1232_v26, %v1231_v21  ;;  %v1202_v37 = vadd.f32 %v2858_v17, %v1105_v27  ;;  %v1010_v38 = vadd.f32 %v2734_v28, %v2670_v23  ;;  %v2862_v39 = vunpack.c.h.bf16 %v2931_v19  ;;  %v3157_v26 = vld [vmem:[%s3564_s29 + $0x40] sm:$0xff]  }
  0x72   : > { %3026 = vmatmul.mubr.msk.bf16.gmra.mrb[4].mxu0 %vm1291_vm1, %v3152_v20  ;;  %v1233_v41 = vmul.f32 0.25, %v1201_v31  ;;  %v1106_v42 = vadd.f32 %v2797_v29, %v1009_v32  ;;  %v2673_v43 = vunpack.c.l.bf16 %v2884_v30  ;;  %v2674_v44 = vunpack.c.h.bf16 %v2884_v30  ;;  %v3158_v30 = vld [vmem:[%s3564_s29 + $0x48] sm:$0xff]   ;;  %v3159_v31 = vld [vmem:[%s3564_s29 + $0x50] sm:$0xff]   ;;  %v3160_v32 = vld [vmem:[%s3564_s29 + $0x58] sm:$0xff]  }
  0x73   : > { %3029 = vmatprep.mubr.msk.bf16.mxu0 %vm1291_vm1, %v3153_v25  ;;  %3008 = vmatmul.mubr.msk.bf16.gmra.mrb[4].mxu1 %vm1291_vm1, %v1285_v36  ;;  %v1234_v45 = vmul.f32 0.25, %v1202_v37  ;;  %v1107_v46 = vadd.f32 %v2798_v33, %v1010_v38  ;;  %v2737_v47 = vunpack.c.l.bf16 %v2900_v35  ;;  %v2738_v48 = vunpack.c.h.bf16 %v2900_v35  ;;  %v3161_v33 = vld [vmem:[%s3564_s29 + $0x60] sm:$0xff]   ;;  %v3163_v35 = vld [vmem:[%s3564_s29 + $0x70] sm:$0xff]   ;;  %v3164_v36 = vld [vmem:[%s3564_s29 + $0x78] sm:$0xff]  }
  0x74   : > { %v1203_v50 = vadd.f32 %v2861_v34, %v1106_v42  ;;  %v2801_v51 = vunpack.c.l.bf16 %v2916_v6  ;;  %v2802_v52 = vunpack.c.h.bf16 %v2916_v6  ;;  %v2865_v53 = vunpack.c.l.bf16 %v2932_v40  ;;  %v3162_v34 = vld [vmem:[%s3564_s29 + $0x68] sm:$0xff]   ;;  %v2076_v37 = vld [vmem:[%s4019_s5] sm:$0xf] }
  0x75   : > { %v1286_v55 = vpack.c.bf16 %v1234_v45, %v1233_v41  ;;  %v1204_v56 = vadd.f32 %v2862_v39, %v1107_v46  ;;  %v1011_v57 = vadd.f32 %v2737_v47, %v2673_v43  ;;  %v1012_v58 = vadd.f32 %v2738_v48, %v2674_v44  ;;  %3124 = vmatprep.subr.msk.bf16.mxu1 %vm2133_vm2, %v2076_v37  ;;  %v3671_v39 = vld [vmem:[%s4018_s4] ss:$0 sm:$0xff] }
  0x76   : > { %v1235_v62 = vmul.f32 0.25, %v1203_v50  ;;  %v2866_v63 = vunpack.c.h.bf16 %v2932_v40  ;;  %v2677_v0 = vunpack.c.l.bf16 %v2885_v49  ;;  %v2678_v1 = vunpack.c.h.bf16 %v2885_v49 }
  0x77   : > { %3011 = vmatprep.mubr.msk.bf16.mxu1 %vm1291_vm1, %v1286_v55  ;;  %v1236_v3 = vmul.f32 0.25, %v1204_v56  ;;  %v1108_v4 = vadd.f32 %v2801_v51, %v1011_v57  ;;  %v1109_v5 = vadd.f32 %v2802_v52, %v1012_v58  ;;  %v2741_v7 = vunpack.c.l.bf16 %v2901_v54 }
  0x78   : > { %v2742_v8 = vunpack.c.h.bf16 %v2901_v54  ;;  %v2805_v9 = vunpack.c.l.bf16 %v2917_v59  ;;  %v2806_v10 = vunpack.c.h.bf16 %v2917_v59  ;;  %v2869_v11 = vunpack.c.l.bf16 %v2933_v60 }
  0x79   : > { %v1287_v12 = vpack.c.bf16 %v1236_v3, %v1235_v62  ;;  %v1205_v13 = vadd.f32 %v2865_v53, %v1108_v4  ;;  %v1206_v14 = vadd.f32 %v2866_v63, %v1109_v5  ;;  %v1013_v15 = vadd.f32 %v2741_v7, %v2677_v0 }
  0x7a   : > { %3030 = vmatmul.mubr.msk.bf16.gmra.mrb[8].mxu0 %vm1291_vm1, %v3154_v61  ;;  %v1014_v16 = vadd.f32 %v2742_v8, %v2678_v1  ;;  %v2870_v17 = vunpack.c.h.bf16 %v2933_v60  ;;  %v2135_v38 = vsel %vm2133_vm2, %v2076_v37, 0 }
  0x7b   : > { %3033 = vmatprep.mubr.msk.bf16.mxu0 %vm1291_vm1, %v3155_v2  ;;  %3012 = vmatmul.mubr.msk.bf16.gmra.mrb[8].mxu1 %vm1291_vm1, %v1287_v12  ;;  %v1237_v18 = vmul.f32 0.25, %v1205_v13  ;;  %v1238_v19 = vmul.f32 0.25, %v1206_v14  ;;  %v1110_v20 = vadd.f32 %v2805_v9, %v1013_v15 }
  0x7c   : > { %v1111_v21 = vadd.f32 %v2806_v10, %v1014_v16  ;;  %3054 = vmatpush3.bf16.msra.mxu1 %v2135_v38 }
  0x7d   : > { %v1288_v22 = vpack.c.bf16 %v1238_v19, %v1237_v18  ;;  %v1207_v23 = vadd.f32 %v2869_v11, %v1110_v20 }
  0x7e   : > { %v1208_v25 = vadd.f32 %v2870_v17, %v1111_v21 }
  0x7f   : > { %3015 = vmatprep.mubr.msk.bf16.mxu1 %vm1291_vm1, %v1288_v22  ;;  %v1239_v27 = vmul.f32 0.25, %v1207_v23 }
  0x80   : > { %v1240_v28 = vmul.f32 0.25, %v1208_v25 }
  0x82   : > { %3034 = vmatmul.mubr.msk.bf16.gmra.mrb[12].mxu0 %vm1291_vm1, %v3156_v24  ;;  %v1289_v29 = vpack.c.bf16 %v1240_v28, %v1239_v27 }
  0x83   : > { %3037 = vmatprep.mubr.msk.bf16.mxu0 %vm1291_vm1, %v3157_v26 }
  0x84   : > { %3016 = vmatmul.mubr.msk.bf16.gmra.mrb[12].mxu1 %vm1291_vm1, %v1289_v29 }
  0x8a   : > { %3038 = vmatmul.mubr.msk.bf16.gmra.mrb[16].mxu0 %vm1291_vm1, %v3158_v30 }
  0x8b   : > { %3041 = vmatprep.mubr.msk.bf16.mxu0 %vm1291_vm1, %v3159_v31 }
  0x92   : > { %3042 = vmatmul.mubr.msk.bf16.gmra.mrb[20].mxu0 %vm1291_vm1, %v3160_v32 }
  0x93   : > { %3045 = vmatprep.mubr.msk.bf16.mxu0 %vm1291_vm1, %v3161_v33 }
  0x9a   : > { %3046 = vmatmul.mubr.msk.bf16.gmra.mrb[24].mxu0 %vm1291_vm1, %v3162_v34 }
  0x9b   : > { %3049 = vmatprep.mubr.msk.bf16.mxu0 %vm1291_vm1, %v3163_v35 }
  0xa2   : > { %3050 = vmatmul.mubr.msk.bf16.gmra.mrb[28].mxu0 %vm1291_vm1, %v3164_v36 }
 0x13d   : > { %v3023_v6 = vpop.f32.mrb[0].mxu0  ;;  %v3673_v40 = vpop.f32.mrb[0].mxu1 }
 0x13e   : > { %v3676_v41 = vadd.f32 %v3023_v6, %v3671_v39  ;;  %v1670_v42 = vpop.f32.mrb[1].mxu0  ;;  %v3678_v43 = vpop.f32.mrb[1].mxu1 }
 0x13f   : > { %v3681_v44 = vadd.f32 %v3671_v39, %v1670_v42  ;;  %v3024_v45 = vpop.f32.mrb[2].mxu0  ;;  %v3683_v46 = vpop.f32.mrb[2].mxu1 }
 0x140   : > { %v2565_v47 = vmul.f32 -1.442695, %v3676_v41  ;;  %v3687_v48 = vadd.f32 %v3024_v45, %v3671_v39  ;;  %v1673_v49 = vpop.f32.mrb[3].mxu0  ;;  %v3689_v50 = vpop.f32.mrb[3].mxu1 }
 0x141   : > { %v2563_v51 = vmul.f32 -1.442695, %v3681_v44  ;;  %v3693_v52 = vadd.f32 %v3671_v39, %v1673_v49 }
 0x142   : > { %3165 = vpow2.f32 %v2565_v47  ;;  %v2566_v53 = vmul.f32 -1.442695, %v3687_v48 }
 0x143   : > { %3167 = vpow2.f32 %v2563_v51  ;;  %v2564_v54 = vmul.f32 -1.442695, %v3693_v52 }
 0x144   : > { %3169 = vpow2.f32 %v2566_v53 }
 0x145   : > { %3171 = vpow2.f32 %v2564_v54  ;;  %v3027_v55 = vpop.f32.mrb[4].mxu0 }
 0x146   : > { %v3698_v56 = vadd.f32 %v3027_v55, %v3671_v39  ;;  %v1686_v57 = vpop.f32.mrb[5].mxu0  ;;  %v3700_v58 = vpop.f32.mrb[4].mxu1 }
 0x147   : > { %v3703_v59 = vadd.f32 %v3671_v39, %v1686_v57  ;;  %v3028_v60 = vpop.f32.mrb[6].mxu0  ;;  %v3705_v61 = vpop.f32.mrb[5].mxu1 }
 0x148   : > { %v2569_v62 = vmul.f32 -1.442695, %v3698_v56  ;;  %v3709_v63 = vadd.f32 %v3028_v60, %v3671_v39  ;;  %v1689_v0 = vpop.f32.mrb[7].mxu0  ;;  %v3711_v1 = vpop.f32.mrb[6].mxu1 }
 0x149   : > { %v2567_v2 = vmul.f32 -1.442695, %v3703_v59  ;;  %v3715_v3 = vadd.f32 %v3671_v39, %v1689_v0  ;;  %v3717_v4 = vpop.f32.mrb[7].mxu1 }
 0x14a   : > { %3173 = vpow2.f32 %v2569_v62  ;;  %v2570_v5 = vmul.f32 -1.442695, %v3709_v63 }
 0x14b   : > { %3175 = vpow2.f32 %v2567_v2  ;;  %v2568_v7 = vmul.f32 -1.442695, %v3715_v3 }
 0x14c   : > { %v3166_v8 = vpop.eup %3165  ;;  %3177 = vpow2.f32 %v2570_v5 }
 0x14d   : > { %v3168_v9 = vpop.eup %3167  ;;  %v1934_v10 = vadd.f32 1.0, %v3166_v8  ;;  %3179 = vpow2.f32 %v2568_v7  ;;  %v3031_v11 = vpop.f32.mrb[8].mxu0 }
 0x14e   : > { %v3170_v12 = vpop.eup %3169  ;;  %v1932_v13 = vadd.f32 1.0, %v3168_v9  ;;  %v3722_v14 = vadd.f32 %v3031_v11, %v3671_v39  ;;  %v1702_v15 = vpop.f32.mrb[9].mxu0 }
 0x14f   : > { %v3724_v16 = vpop.f32.mrb[8].mxu1  ;;  %v3172_v17 = vpop.eup %3171  ;;  %3181 = vrcp.f32 %v1934_v10  ;;  %v1935_v18 = vadd.f32 1.0, %v3170_v12  ;;  %v3727_v19 = vadd.f32 %v3671_v39, %v1702_v15 }
 0x150   : > { %v3032_v20 = vpop.f32.mrb[10].mxu0  ;;  %v3729_v21 = vpop.f32.mrb[9].mxu1  ;;  %3183 = vrcp.f32 %v1932_v13  ;;  %v1933_v22 = vadd.f32 1.0, %v3172_v17  ;;  %v2573_v23 = vmul.f32 -1.442695, %v3722_v14 }
 0x151   : > { %v3733_v24 = vadd.f32 %v3032_v20, %v3671_v39  ;;  %v1705_v25 = vpop.f32.mrb[11].mxu0  ;;  %v3735_v26 = vpop.f32.mrb[10].mxu1  ;;  %3185 = vrcp.f32 %v1935_v18  ;;  %v2571_v27 = vmul.f32 -1.442695, %v3727_v19 }
 0x152   : > { %v3739_v28 = vadd.f32 %v3671_v39, %v1705_v25  ;;  %v3741_v29 = vpop.f32.mrb[11].mxu1  ;;  %3187 = vrcp.f32 %v1933_v22 }
 0x153   : > { %v2574_v30 = vmul.f32 -1.442695, %v3733_v24  ;;  %3189 = vpow2.f32 %v2573_v23 }
 0x154   : > { %v2572_v31 = vmul.f32 -1.442695, %v3739_v28  ;;  %v3174_v32 = vpop.eup %3173  ;;  %3191 = vpow2.f32 %v2571_v27 }
 0x155   : > { %v3176_v33 = vpop.eup %3175  ;;  %v1938_v34 = vadd.f32 1.0, %v3174_v32  ;;  %3193 = vpow2.f32 %v2574_v30  ;;  %v3035_v35 = vpop.f32.mrb[12].mxu0 }
 0x156   : > { %v3178_v36 = vpop.eup %3177  ;;  %v1936_v37 = vadd.f32 1.0, %v3176_v33  ;;  %3195 = vpow2.f32 %v2572_v31  ;;  %v3746_v38 = vadd.f32 %v3035_v35, %v3671_v39  ;;  %v1718_v6 = vpop.f32.mrb[13].mxu0 }
 0x157   : > { %v3180_v42 = vpop.eup %3179  ;;  %3197 = vrcp.f32 %v1938_v34  ;;  %v1939_v45 = vadd.f32 1.0, %v3178_v36  ;;  %v3749_v47 = vadd.f32 %v3671_v39, %v1718_v6  ;;  %v3036_v49 = vpop.f32.mrb[14].mxu0 }
 0x158   : > { %v3751_v51 = vpop.f32.mrb[12].mxu1  ;;  %3199 = vrcp.f32 %v1936_v37  ;;  %v1937_v53 = vadd.f32 1.0, %v3180_v42  ;;  %v2577_v54 = vmul.f32 -1.442695, %v3746_v38  ;;  %v3755_v55 = vadd.f32 %v3036_v49, %v3671_v39  ;;  %v1721_v57 = vpop.f32.mrb[15].mxu0 }
 0x159   : > { %v3757_v60 = vpop.f32.mrb[13].mxu1  ;;  %v3182_v62 = vpop.eup %3181  ;;  %3201 = vrcp.f32 %v1939_v45  ;;  %v2575_v0 = vmul.f32 -1.442695, %v3749_v47  ;;  %v3761_v2 = vadd.f32 %v3671_v39, %v1721_v57 }
 0x15a   : > { %v3763_v5 = vpop.f32.mrb[14].mxu1  ;;  %v3184_v7 = vpop.eup %3183  ;;  %3203 = vrcp.f32 %v1937_v53  ;;  %v2578_v8 = vmul.f32 -1.442695, %v3755_v55  ;;  %v2030_v13 = vmul.f32 %v3182_v62, %v3676_v41 }
 0x15b   : > { %v3766_v9 = vpop.f32.mrb[15].mxu1  ;;  %v3186_v10 = vpop.eup %3185  ;;  %3205 = vpow2.f32 %v2577_v54  ;;  %v2576_v11 = vmul.f32 -1.442695, %v3761_v2  ;;  %v2028_v18 = vmul.f32 %v3184_v7, %v3681_v44 }
 0x15c   : > { %v3188_v12 = vpop.eup %3187  ;;  %v2031_v15 = vmul.f32 %v3186_v10, %v3687_v48  ;;  %3207 = vpow2.f32 %v2575_v0 }
 0x15d   : > { %v3190_v17 = vpop.eup %3189  ;;  %v2029_v20 = vmul.f32 %v3188_v12, %v3693_v52  ;;  %3209 = vpow2.f32 %v2578_v8  ;;  %v3039_v22 = vpop.f32.mrb[16].mxu0 }
 0x15e   : > { %v3192_v23 = vpop.eup %3191  ;;  %v2061_v25 = vpack.c.bf16 %v2031_v15, %v2030_v13  ;;  %v1942_v27 = vadd.f32 1.0, %v3190_v17  ;;  %3211 = vpow2.f32 %v2576_v11  ;;  %v1743_v30 = vadd.f32 %v3039_v22, %v3673_v40  ;;  %v1734_v31 = vpop.f32.mrb[17].mxu0 }
 0x15f   : > { %v3194_v32 = vpop.eup %3193  ;;  %v2060_v41 = vpack.c.bf16 %v2029_v20, %v2028_v18  ;;  %v1940_v33 = vadd.f32 1.0, %v3192_v23  ;;  %v1735_v48 = vadd.f32 %v1734_v31, %v3678_v43  ;;  %v3040_v34 = vpop.f32.mrb[18].mxu0 }
 0x160   : > { %v3196_v35 = vpop.eup %3195  ;;  %3213 = vrcp.f32 %v1942_v27  ;;  %v1943_v44 = vadd.f32 1.0, %v3194_v32  ;;  %v3776_v52 = vadd.f32 %v3671_v39, %v1743_v30  ;;  %v1746_v36 = vadd.f32 %v3040_v34, %v3683_v46  ;;  %v1737_v37 = vpop.f32.mrb[19].mxu0 }
 0x161   : > { %v3198_v6 = vpop.eup %3197  ;;  %3215 = vrcp.f32 %v1940_v33  ;;  %v1941_v42 = vadd.f32 1.0, %v3196_v35  ;;  %v3780_v40 = vadd.f32 %v3671_v39, %v1735_v48  ;;  %v1738_v45 = vadd.f32 %v1737_v37, %v3689_v50  ;;  %3055 = vmatprep.mubr.msk.bf16.mxu1 %vm2084_vm3, %v2060_v41 }
 0x162   : > { %v3200_v43 = vpop.eup %3199  ;;  %3217 = vrcp.f32 %v1943_v44  ;;  %v2581_v49 = vmul.f32 -1.442695, %v3776_v52  ;;  %v3786_v53 = vadd.f32 %v3671_v39, %v1746_v36  ;;  %3056 = vmatmul.mubr.msk.bf16.vlgmr.msra.gmra.mrb[16].mxu1 %vm2084_vm3, %v2061_v25  ;;  %v2034_v50 = vmul.f32 %v3198_v6, %v3698_v56 }
 0x163   : > { %v3202_v46 = vpop.eup %3201  ;;  %3219 = vrcp.f32 %v1941_v42  ;;  %v2579_v54 = vmul.f32 -1.442695, %v3780_v40  ;;  %v3791_v57 = vadd.f32 %v3671_v39, %v1738_v45  ;;  %v2032_v10 = vmul.f32 %v3200_v43, %v3703_v59 }
 0x164   : > { %v3204_v62 = vpop.eup %3203  ;;  %v2035_v0 = vmul.f32 %v3202_v46, %v3709_v63  ;;  %3221 = vpow2.f32 %v2581_v49  ;;  %v2582_v7 = vmul.f32 -1.442695, %v3786_v53 }
 0x165   : > { %v3206_v8 = vpop.eup %3205  ;;  %v2033_v11 = vmul.f32 %v3204_v62, %v3715_v3  ;;  %3223 = vpow2.f32 %v2579_v54  ;;  %v2580_v12 = vmul.f32 -1.442695, %v3791_v57  ;;  %v3043_v13 = vpop.f32.mrb[20].mxu0 }
 0x166   : > { %v3208_v15 = vpop.eup %3207  ;;  %v2063_v17 = vpack.c.bf16 %v2035_v0, %v2034_v50  ;;  %v1946_v18 = vadd.f32 1.0, %v3206_v8  ;;  %3225 = vpow2.f32 %v2582_v7  ;;  %v1759_v56 = vadd.f32 %v3043_v13, %v3700_v58  ;;  %v1750_v20 = vpop.f32.mrb[21].mxu0 }
 0x167   : > { %v3210_v63 = vpop.eup %3209  ;;  %v2062_v22 = vpack.c.bf16 %v2033_v11, %v2032_v10  ;;  %v1944_v23 = vadd.f32 1.0, %v3208_v15  ;;  %3227 = vpow2.f32 %v2580_v12  ;;  %v1751_v25 = vadd.f32 %v1750_v20, %v3705_v61  ;;  %v3044_v59 = vpop.f32.mrb[22].mxu0 }
 0x168   : > { %v3212_v27 = vpop.eup %3211  ;;  %3229 = vrcp.f32 %v1946_v18  ;;  %v1947_v3 = vadd.f32 1.0, %v3210_v63  ;;  %v3802_v30 = vadd.f32 %v3671_v39, %v1759_v56  ;;  %v1762_v31 = vadd.f32 %v3044_v59, %v3711_v1  ;;  %v1753_v32 = vpop.f32.mrb[23].mxu0 }
 0x169   : > { %3231 = vrcp.f32 %v1944_v23  ;;  %v1945_v41 = vadd.f32 1.0, %v3212_v27  ;;  %v3806_v58 = vadd.f32 %v3671_v39, %v1751_v25  ;;  %v1754_v33 = vadd.f32 %v1753_v32, %v3717_v4  ;;  %3059 = vmatprep.mubr.msk.bf16.mxu1 %vm2084_vm3, %v2062_v22 }
 0x16a   : > { %v3214_v61 = vpop.eup %3213  ;;  %3233 = vrcp.f32 %v1947_v3  ;;  %v2585_v48 = vmul.f32 -1.442695, %v3802_v30  ;;  %v3812_v34 = vadd.f32 %v3671_v39, %v1762_v31  ;;  %3060 = vmatmul.mubr.msk.bf16.gmra.mrb[20].mxu1 %vm2084_vm3, %v2063_v17 }
 0x16b   : > { %v3216_v1 = vpop.eup %3215  ;;  %3235 = vrcp.f32 %v1945_v41  ;;  %v2583_v35 = vmul.f32 -1.442695, %v3806_v58  ;;  %v3817_v44 = vadd.f32 %v3671_v39, %v1754_v33  ;;  %v2038_v6 = vmul.f32 %v3214_v61, %v3722_v14 }
 0x16c   : > { %v3218_v36 = vpop.eup %3217  ;;  %3237 = vpow2.f32 %v2585_v48  ;;  %v2586_v4 = vmul.f32 -1.442695, %v3812_v34  ;;  %v2036_v46 = vmul.f32 %v3216_v1, %v3727_v19 }
 0x16d   : > { %v3220_v37 = vpop.eup %3219  ;;  %v2039_v42 = vmul.f32 %v3218_v36, %v3733_v24  ;;  %3239 = vpow2.f32 %v2583_v35  ;;  %v2584_v45 = vmul.f32 -1.442695, %v3817_v44  ;;  %v3047_v43 = vpop.f32.mrb[24].mxu0 }
 0x16e   : > { %v3222_v49 = vpop.eup %3221  ;;  %v2037_v54 = vmul.f32 %v3220_v37, %v3739_v28  ;;  %3241 = vpow2.f32 %v2586_v4  ;;  %v1775_v62 = vadd.f32 %v3047_v43, %v3724_v16  ;;  %v1766_v50 = vpop.f32.mrb[25].mxu0 }
 0x16f   : > { %v3224_v0 = vpop.eup %3223  ;;  %v2065_v7 = vpack.c.bf16 %v2039_v42, %v2038_v6  ;;  %v1950_v8 = vadd.f32 1.0, %v3222_v49  ;;  %3243 = vpow2.f32 %v2584_v45  ;;  %v1767_v14 = vadd.f32 %v1766_v50, %v3729_v21  ;;  %v3048_v24 = vpop.f32.mrb[26].mxu0 }
 0x170   : > { %v3226_v10 = vpop.eup %3225  ;;  %v2064_v11 = vpack.c.bf16 %v2037_v54, %v2036_v46  ;;  %v1948_v12 = vadd.f32 1.0, %v3224_v0  ;;  %v3828_v13 = vadd.f32 %v3671_v39, %v1775_v62  ;;  %v1778_v19 = vadd.f32 %v3048_v24, %v3735_v26  ;;  %v1769_v28 = vpop.f32.mrb[27].mxu0 }
 0x171   : > { %v3228_v15 = vpop.eup %3227  ;;  %3245 = vrcp.f32 %v1950_v8  ;;  %v1951_v16 = vadd.f32 1.0, %v3226_v10  ;;  %v3832_v17 = vadd.f32 %v3671_v39, %v1767_v14  ;;  %v1770_v18 = vadd.f32 %v1769_v28, %v3741_v29 }
 0x172   : > { %v3230_v56 = vpop.eup %3229  ;;  %3247 = vrcp.f32 %v1948_v12  ;;  %v1949_v21 = vadd.f32 1.0, %v3228_v15  ;;  %v2589_v20 = vmul.f32 -1.442695, %v3828_v13  ;;  %v3837_v63 = vadd.f32 %v3671_v39, %v1778_v19  ;;  %3063 = vmatprep.mubr.msk.bf16.mxu1 %vm2084_vm3, %v2064_v11 }
 0x173   : > { %v3232_v26 = vpop.eup %3231  ;;  %3249 = vrcp.f32 %v1951_v16  ;;  %v2587_v22 = vmul.f32 -1.442695, %v3832_v17  ;;  %v3842_v23 = vadd.f32 %v3671_v39, %v1770_v18  ;;  %3064 = vmatmul.mubr.msk.bf16.gmra.mrb[24].mxu1 %vm2084_vm3, %v2065_v7  ;;  %v2042_v27 = vmul.f32 %v3230_v56, %v3746_v38 }
 0x174   : > { %v3234_v29 = vpop.eup %3233  ;;  %3251 = vrcp.f32 %v1949_v21  ;;  %v2590_v25 = vmul.f32 -1.442695, %v3837_v63  ;;  %v2040_v33 = vmul.f32 %v3232_v26, %v3749_v47 }
 0x175   : > { %v3236_v59 = vpop.eup %3235  ;;  %v2043_v3 = vmul.f32 %v3234_v29, %v3755_v55  ;;  %3253 = vpow2.f32 %v2589_v20  ;;  %v2588_v31 = vmul.f32 -1.442695, %v3842_v23  ;;  %v3051_v32 = vpop.f32.mrb[28].mxu0 }
 0x176   : > { %v3238_v41 = vpop.eup %3237  ;;  %v2041_v61 = vmul.f32 %v3236_v59, %v3761_v2  ;;  %3255 = vpow2.f32 %v2587_v22  ;;  %v1791_v48 = vadd.f32 %v3051_v32, %v3751_v51  ;;  %v1782_v1 = vpop.f32.mrb[29].mxu0 }
 0x177   : > { %v3240_v35 = vpop.eup %3239  ;;  %v2067_v36 = vpack.c.bf16 %v2043_v3, %v2042_v27  ;;  %v1954_v4 = vadd.f32 1.0, %v3238_v41  ;;  %3257 = vpow2.f32 %v2590_v25  ;;  %v1783_v38 = vadd.f32 %v1782_v1, %v3757_v60  ;;  %v3052_v55 = vpop.f32.mrb[30].mxu0 }
 0x178   : > { %v3242_v37 = vpop.eup %3241  ;;  %v2066_v6 = vpack.c.bf16 %v2041_v61, %v2040_v33  ;;  %v1952_v42 = vadd.f32 1.0, %v3240_v35  ;;  %3259 = vpow2.f32 %v2588_v31  ;;  %v3854_v45 = vadd.f32 %v3671_v39, %v1791_v48  ;;  %v1785_v47 = vpop.f32.mrb[31].mxu0 }
 0x179   : > { %v3244_v2 = vpop.eup %3243  ;;  %3261 = vrcp.f32 %v1954_v4  ;;  %v1955_v43 = vadd.f32 1.0, %v3242_v37  ;;  %v3857_v51 = vadd.f32 %v3671_v39, %v1783_v38  ;;  %v1794_v49 = vadd.f32 %v3052_v55, %v3763_v5 }
 0x17a   : > { %3263 = vrcp.f32 %v1952_v42  ;;  %v1953_v46 = vadd.f32 1.0, %v3244_v2  ;;  %v2593_v60 = vmul.f32 -1.442695, %v3854_v45  ;;  %v1786_v54 = vadd.f32 %v1785_v47, %v3766_v9  ;;  %3067 = vmatprep.mubr.msk.bf16.mxu1 %vm2084_vm3, %v2066_v6 }
 0x17b   : > { %v3246_v62 = vpop.eup %3245  ;;  %3265 = vrcp.f32 %v1955_v43  ;;  %v2591_v50 = vmul.f32 -1.442695, %v3857_v51  ;;  %v3865_v0 = vadd.f32 %v3671_v39, %v1794_v49  ;;  %3068 = vmatmul.mubr.msk.bf16.gmra.mrb[28].mxu1 %vm2084_vm3, %v2067_v36 }
 0x17c   : > { %v3248_v7 = vpop.eup %3247  ;;  %3267 = vrcp.f32 %v1953_v46  ;;  %v3869_v5 = vadd.f32 %v3671_v39, %v1786_v54  ;;  %v2046_v24 = vmul.f32 %v3246_v62, %v3776_v52  ;;  %v3901_v54 = vld [vmem:[%s4020_s6] ss:$0 sm:$0xff] }
 0x17d   : > { %v3250_v8 = vpop.eup %3249  ;;  %3269 = vpow2.f32 %v2593_v60  ;;  %v2594_v9 = vmul.f32 -1.442695, %v3865_v0  ;;  %v2044_v19 = vmul.f32 %v3248_v7, %v3780_v40 }
 0x17e   : > { %v3252_v14 = vpop.eup %3251  ;;  %v2047_v10 = vmul.f32 %v3250_v8, %v3786_v53  ;;  %3271 = vpow2.f32 %v2591_v50  ;;  %v2592_v11 = vmul.f32 -1.442695, %v3869_v5 }
 0x17f   : > { %v3254_v12 = vpop.eup %3253  ;;  %v2045_v28 = vmul.f32 %v3252_v14, %v3791_v57  ;;  %3273 = vpow2.f32 %v2594_v9 }
 0x180   : > { %v3256_v39 = vpop.eup %3255  ;;  %v2069_v15 = vpack.c.bf16 %v2047_v10, %v2046_v24  ;;  %v1958_v16 = vadd.f32 1.0, %v3254_v12  ;;  %3275 = vpow2.f32 %v2592_v11 }
 0x181   : > { %v3258_v18 = vpop.eup %3257  ;;  %v2068_v56 = vpack.c.bf16 %v2045_v28, %v2044_v19  ;;  %v1956_v21 = vadd.f32 1.0, %v3256_v39 }
 0x182   : > { %v3260_v20 = vpop.eup %3259  ;;  %3277 = vrcp.f32 %v1958_v16  ;;  %v1959_v52 = vadd.f32 1.0, %v3258_v18 }
 0x183   : > { %v3262_v53 = vpop.eup %3261  ;;  %3279 = vrcp.f32 %v1956_v21  ;;  %v1957_v26 = vadd.f32 1.0, %v3260_v20  ;;  %3071 = vmatprep.mubr.msk.bf16.mxu1 %vm2084_vm3, %v2068_v56 }
 0x184   : > { %v3264_v22 = vpop.eup %3263  ;;  %3281 = vrcp.f32 %v1959_v52  ;;  %3072 = vmatmul.mubr.msk.bf16.gmra.mrb[32].mxu1 %vm2084_vm3, %v2069_v15  ;;  %v2050_v29 = vmul.f32 %v3262_v53, %v3802_v30 }
 0x185   : > { %v3266_v40 = vpop.eup %3265  ;;  %3283 = vrcp.f32 %v1957_v26  ;;  %v2048_v27 = vmul.f32 %v3264_v22, %v3806_v58 }
 0x186   : > { %v3268_v57 = vpop.eup %3267  ;;  %v2051_v25 = vmul.f32 %v3266_v40, %v3812_v34 }
 0x187   : > { %v3270_v59 = vpop.eup %3269  ;;  %v2049_v3 = vmul.f32 %v3268_v57, %v3817_v44 }
 0x188   : > { %v3272_v31 = vpop.eup %3271  ;;  %v2071_v32 = vpack.c.bf16 %v2051_v25, %v2050_v29  ;;  %v1962_v41 = vadd.f32 1.0, %v3270_v59 }
 0x189   : > { %v3274_v33 = vpop.eup %3273  ;;  %v2070_v61 = vpack.c.bf16 %v2049_v3, %v2048_v27  ;;  %v1960_v48 = vadd.f32 1.0, %v3272_v31 }
 0x18a   : > { %v3276_v1 = vpop.eup %3275  ;;  %3285 = vrcp.f32 %v1962_v41  ;;  %v1963_v35 = vadd.f32 1.0, %v3274_v33 }
 0x18b   : > { %3287 = vrcp.f32 %v1960_v48  ;;  %v1961_v36 = vadd.f32 1.0, %v3276_v1  ;;  %3075 = vmatprep.mubr.msk.bf16.mxu1 %vm2084_vm3, %v2070_v61 }
 0x18c   : > { %v3278_v30 = vpop.eup %3277  ;;  %3289 = vrcp.f32 %v1963_v35  ;;  %3076 = vmatmul.mubr.msk.bf16.gmra.mrb[36].mxu1 %vm2084_vm3, %v2071_v32 }
 0x18d   : > { %v3280_v58 = vpop.eup %3279  ;;  %3291 = vrcp.f32 %v1961_v36  ;;  %v2054_v4 = vmul.f32 %v3278_v30, %v3828_v13 }
 0x18e   : > { %v3282_v34 = vpop.eup %3281  ;;  %v2052_v55 = vmul.f32 %v3280_v58, %v3832_v17 }
 0x18f   : > { %v3284_v44 = vpop.eup %3283  ;;  %v2055_v38 = vmul.f32 %v3282_v34, %v3837_v63 }
 0x190   : > { %v2053_v37 = vmul.f32 %v3284_v44, %v3842_v23 }
 0x191   : > { %v2073_v6 = vpack.c.bf16 %v2055_v38, %v2054_v4 }
 0x192   : > { %v2072_v42 = vpack.c.bf16 %v2053_v37, %v2052_v55 }
 0x194   : > { %v3286_v47 = vpop.eup %3285  ;;  %3079 = vmatprep.mubr.msk.bf16.mxu1 %vm2084_vm3, %v2072_v42 }
 0x195   : > { %v3288_v2 = vpop.eup %3287  ;;  %3080 = vmatmul.mubr.msk.bf16.gmra.mrb[40].mxu1 %vm2084_vm3, %v2073_v6  ;;  %v2058_v46 = vmul.f32 %v3286_v47, %v3854_v45 }
 0x196   : > { %v3290_v43 = vpop.eup %3289  ;;  %v2056_v63 = vmul.f32 %v3288_v2, %v3857_v51 }
 0x197   : > { %v3292_v49 = vpop.eup %3291  ;;  %v2059_v13 = vmul.f32 %v3290_v43, %v3865_v0 }
 0x198   : > { %v2057_v17 = vmul.f32 %v3292_v49, %v3869_v5 }
 0x199   : > { %v2075_v23 = vpack.c.bf16 %v2059_v13, %v2058_v46 }
 0x19a   : > { %v2074_v60 = vpack.c.bf16 %v2057_v17, %v2056_v63 }
 0x19c   : > { %3083 = vmatprep.mubr.msk.bf16.mxu1 %vm2084_vm3, %v2074_v60 }
 0x19d   : > { %3084 = vmatmul.mubr.msk.bf16.gmra.mrb[44].mxu1 %vm2084_vm3, %v2075_v23 }
 0x235   : > { %v3057_v45 = vpop.f32.mrb[16].mxu1 }
 0x236   : > { %v2180_v51 = vadd.f32 %v3057_v45, %v3901_v54  ;;  %v2171_v62 = vpop.f32.mrb[17].mxu1 }
 0x237   : > { %v2172_v50 = vadd.f32 %v3901_v54, %v2171_v62  ;;  %v3058_v0 = vpop.f32.mrb[18].mxu1 }
 0x238   : > { %2301 = vst.msk [vmem:[%s3906_s17 + $0x10] sm:$0xff] %vm2298_vm4, %v2180_v51  ;;  %v2183_v7 = vadd.f32 %v3058_v0, %v3901_v54  ;;  %v2174_v5 = vpop.f32.mrb[19].mxu1 }
 0x239   : > { %2299 = vst.msk [vmem:[%s3906_s17] sm:$0xff] %vm2298_vm4, %v2172_v50  ;;  %v2175_v8 = vadd.f32 %v3901_v54, %v2174_v5 }
 0x23a   : > { %2302 = vst.msk [vmem:[%s3906_s17 + $0x18] sm:$0xff] %vm2298_vm4, %v2183_v7 }
 0x23b   : > { %2300 = vst.msk [vmem:[%s3906_s17 + $0x8] sm:$0xff] %vm2298_vm4, %v2175_v8 }
 0x23d   : > { %v3061_v9 = vpop.f32.mrb[20].mxu1 }
 0x23e   : > { %v2196_v14 = vadd.f32 %v3061_v9, %v3901_v54  ;;  %v2187_v24 = vpop.f32.mrb[21].mxu1 }
 0x23f   : > { %v2188_v10 = vadd.f32 %v3901_v54, %v2187_v24  ;;  %v3062_v11 = vpop.f32.mrb[22].mxu1 }
 0x240   : > { %2305 = vst.msk [vmem:[%s3906_s17 + $0x30] sm:$0xff] %vm2298_vm4, %v2196_v14  ;;  %v2199_v12 = vadd.f32 %v3062_v11, %v3901_v54  ;;  %v2190_v19 = vpop.f32.mrb[23].mxu1 }
 0x241   : > { %2303 = vst.msk [vmem:[%s3906_s17 + $0x20] sm:$0xff] %vm2298_vm4, %v2188_v10  ;;  %v2191_v28 = vadd.f32 %v3901_v54, %v2190_v19 }
 0x242   : > { %2306 = vst.msk [vmem:[%s3906_s17 + $0x38] sm:$0xff] %vm2298_vm4, %v2199_v12 }
 0x243   : > { %2304 = vst.msk [vmem:[%s3906_s17 + $0x28] sm:$0xff] %vm2298_vm4, %v2191_v28 }
 0x246   : > { %v3065_v39 = vpop.f32.mrb[24].mxu1 }
 0x247   : > { %v2212_v15 = vadd.f32 %v3065_v39, %v3901_v54  ;;  %v2203_v16 = vpop.f32.mrb[25].mxu1 }
 0x248   : > { %v2204_v18 = vadd.f32 %v3901_v54, %v2203_v16  ;;  %v3066_v56 = vpop.f32.mrb[26].mxu1 }
 0x249   : > { %2309 = vst.msk [vmem:[%s3906_s17 + $0x50] sm:$0xff] %vm2298_vm4, %v2212_v15  ;;  %v2215_v21 = vadd.f32 %v3066_v56, %v3901_v54  ;;  %v2206_v20 = vpop.f32.mrb[27].mxu1 }
 0x24a   : > { %2307 = vst.msk [vmem:[%s3906_s17 + $0x40] sm:$0xff] %vm2298_vm4, %v2204_v18  ;;  %v2207_v52 = vadd.f32 %v3901_v54, %v2206_v20 }
 0x24b   : > { %2310 = vst.msk [vmem:[%s3906_s17 + $0x58] sm:$0xff] %vm2298_vm4, %v2215_v21 }
 0x24c   : > { %2308 = vst.msk [vmem:[%s3906_s17 + $0x48] sm:$0xff] %vm2298_vm4, %v2207_v52 }
 0x24e   : > { %v3069_v53 = vpop.f32.mrb[28].mxu1 }
 0x24f   : > { %v2228_v26 = vadd.f32 %v3069_v53, %v3901_v54  ;;  %v2219_v22 = vpop.f32.mrb[29].mxu1 }
 0x250   : > { %v2220_v40 = vadd.f32 %v3901_v54, %v2219_v22  ;;  %v3070_v57 = vpop.f32.mrb[30].mxu1 }
 0x251   : > { %2313 = vst.msk [vmem:[%s3906_s17 + $0x70] sm:$0xff] %vm2298_vm4, %v2228_v26  ;;  %v2231_v29 = vadd.f32 %v3070_v57, %v3901_v54  ;;  %v2222_v25 = vpop.f32.mrb[31].mxu1 }
 0x252   : > { %2311 = vst.msk [vmem:[%s3906_s17 + $0x60] sm:$0xff] %vm2298_vm4, %v2220_v40  ;;  %v2223_v59 = vadd.f32 %v3901_v54, %v2222_v25 }
 0x253   : > { %2314 = vst.msk [vmem:[%s3906_s17 + $0x78] sm:$0xff] %vm2298_vm4, %v2231_v29 }
 0x254   : > { %2312 = vst.msk [vmem:[%s3906_s17 + $0x68] sm:$0xff] %vm2298_vm4, %v2223_v59 }
 0x257   : > { %v3073_v27 = vpop.f32.mrb[32].mxu1 }
 0x258   : > { %v2244_v3 = vadd.f32 %v3073_v27, %v3901_v54  ;;  %v2235_v31 = vpop.f32.mrb[33].mxu1 }
 0x259   : > { %v2236_v32 = vadd.f32 %v3901_v54, %v2235_v31  ;;  %v3074_v41 = vpop.f32.mrb[34].mxu1 }
 0x25a   : > { %2317 = vst.msk [vmem:[%s3906_s17 + $0x90] sm:$0xff] %vm2298_vm4, %v2244_v3  ;;  %v2247_v33 = vadd.f32 %v3074_v41, %v3901_v54  ;;  %v2238_v61 = vpop.f32.mrb[35].mxu1 }
 0x25b   : > { %2315 = vst.msk [vmem:[%s3906_s17 + $0x80] sm:$0xff] %vm2298_vm4, %v2236_v32  ;;  %v2239_v48 = vadd.f32 %v3901_v54, %v2238_v61 }
 0x25c   : > { %2318 = vst.msk [vmem:[%s3906_s17 + $0x98] sm:$0xff] %vm2298_vm4, %v2247_v33 }
 0x25d   : > { %2316 = vst.msk [vmem:[%s3906_s17 + $0x88] sm:$0xff] %vm2298_vm4, %v2239_v48 }
 0x25f   : > { %v3077_v1 = vpop.f32.mrb[36].mxu1 }
 0x260   : > { %v2260_v35 = vadd.f32 %v3077_v1, %v3901_v54  ;;  %v2251_v36 = vpop.f32.mrb[37].mxu1 }
 0x261   : > { %v2252_v30 = vadd.f32 %v3901_v54, %v2251_v36  ;;  %v3078_v58 = vpop.f32.mrb[38].mxu1 }
 0x262   : > { %2321 = vst.msk [vmem:[%s3906_s17 + $0xb0] sm:$0xff] %vm2298_vm4, %v2260_v35  ;;  %v2263_v34 = vadd.f32 %v3078_v58, %v3901_v54  ;;  %v2254_v44 = vpop.f32.mrb[39].mxu1 }
 0x263   : > { %2319 = vst.msk [vmem:[%s3906_s17 + $0xa0] sm:$0xff] %vm2298_vm4, %v2252_v30  ;;  %v2255_v4 = vadd.f32 %v3901_v54, %v2254_v44 }
 0x264   : > { %2322 = vst.msk [vmem:[%s3906_s17 + $0xb8] sm:$0xff] %vm2298_vm4, %v2263_v34 }
 0x265   : > { %2320 = vst.msk [vmem:[%s3906_s17 + $0xa8] sm:$0xff] %vm2298_vm4, %v2255_v4 }
 0x268   : > { %v3081_v38 = vpop.f32.mrb[40].mxu1 }
 0x269   : > { %v2276_v55 = vadd.f32 %v3081_v38, %v3901_v54  ;;  %v2267_v37 = vpop.f32.mrb[41].mxu1 }
 0x26a   : > { %v2268_v6 = vadd.f32 %v3901_v54, %v2267_v37  ;;  %v3082_v42 = vpop.f32.mrb[42].mxu1 }
 0x26b   : > { %2325 = vst.msk [vmem:[%s3906_s17 + $0xd0] sm:$0xff] %vm2298_vm4, %v2276_v55  ;;  %v2279_v47 = vadd.f32 %v3082_v42, %v3901_v54  ;;  %v2270_v2 = vpop.f32.mrb[43].mxu1 }
 0x26c   : > { %2323 = vst.msk [vmem:[%s3906_s17 + $0xc0] sm:$0xff] %vm2298_vm4, %v2268_v6  ;;  %v2271_v43 = vadd.f32 %v3901_v54, %v2270_v2 }
 0x26d   : > { %2326 = vst.msk [vmem:[%s3906_s17 + $0xd8] sm:$0xff] %vm2298_vm4, %v2279_v47 }
 0x26e   : > { %2324 = vst.msk [vmem:[%s3906_s17 + $0xc8] sm:$0xff] %vm2298_vm4, %v2271_v43 }
 0x270   : > { %v3085_v49 = vpop.f32.mrb[44].mxu1 }
 0x271   : > { %v2292_v46 = vadd.f32 %v3085_v49, %v3901_v54  ;;  %v2283_v13 = vpop.f32.mrb[45].mxu1 }
 0x272   : > { %v2284_v63 = vadd.f32 %v3901_v54, %v2283_v13  ;;  %v3086_v17 = vpop.f32.mrb[46].mxu1 }
 0x273   : > { %2329 = vst.msk [vmem:[%s3906_s17 + $0xf0] sm:$0xff] %vm2298_vm4, %v2292_v46  ;;  %v2295_v23 = vadd.f32 %v3086_v17, %v3901_v54  ;;  %v2286_v60 = vpop.f32.mrb[47].mxu1 }
 0x274   : > { %2327 = vst.msk [vmem:[%s3906_s17 + $0xe0] sm:$0xff] %vm2298_vm4, %v2284_v63  ;;  %v2287_v45 = vadd.f32 %v3901_v54, %v2286_v60 }
 0x275   : > { %2330 = vst.msk [vmem:[%s3906_s17 + $0xf8] sm:$0xff] %vm2298_vm4, %v2295_v23 }
 0x276   : > { %2328 = vst.msk [vmem:[%s3906_s17 + $0xe8] sm:$0xff] %vm2298_vm4, %v2287_v45 }
 0x277 PF: > { %p14_p9 = scmp.ge.s32.totalorder %s3374_s28, 4   ;;  %s4022_s24 = smov %s3311_s25 }
 0x278   : > { %s4023_s25 = smov %s3383_s8  ;;  %s4024_s26 = smov %s3374_s28 }
 0x279   :  { %16 = sbr.rel (!%p14_p9) target bundleno = 2 (0x2), region = 130 }

</bundles_post_ra>
